<compile_context>
chip_gen: v7x
topology: tpu7x:2x2x1
jax: 0.10.0
libtpu: 0.0.40
codegen_flags: <defaults>
</compile_context>

<pallas_src>
import numpy as np
import jax
import jax.numpy as jnp
from jax import lax
from jax.experimental import pallas as pl
from jax.experimental.pallas import tpu as pltpu

LEAKY_SLOPE = 0.01   # torch.nn.LeakyReLU default negative_slope
BN_EPS = 1e-5        # torch.nn.BatchNorm2d default eps


def make_temporal_transition_kernel(TR, W, C, Wp, pad, taps, out_chs, pool):
    """Kernel over one row tile: rows = TR entries of the flattened N*H axis."""

    def kernel(x_ref, scale_ref, shift_ref, w1_ref, b1_ref, w2_ref, b2_ref,
               w3_ref, b3_ref, out_ref, act_scr, slab_scr):
        w_refs = (w1_ref, w2_ref, w3_ref)
        b_refs = (b1_ref, b2_ref, b3_ref)

        # (TR, W*C): bf16 DMA'd tile, upcast once to f32 for all elementwise math.
        x = x_ref[...].astype(jnp.float32)

        # Keep the conv zero-padding lanes of the activation scratch at exactly 0.
        # Done every step (cheap) so it stays correct when the "parallel" grid
        # axis is sharded across TensorCores (each core has its own scratch).
        zpad = jnp.zeros((TR, pad * C), jnp.float32)
        act_scr[:, 0:pad * C] = zpad
        act_scr[:, (pad + W) * C:(2 * pad + W) * C] = zpad

        c0 = 0
        for bi in range(3):
            tk, ob = taps[bi], out_chs[bi]
            K = tk * C
            off = pad - tk // 2

            # BatchNorm2d (inference, folded) + LeakyReLU, lane-dense over W*C.
            a = x * scale_ref[bi:bi + 1, :] + shift_ref[bi:bi + 1, :]
            a = jnp.where(a >= 0, a, LEAKY_SLOPE * a)
            act_scr[:, pad * C:(pad + W) * C] = a   # pad lanes stay zero

            # Conv + MaxPool fused: for each pool phase p, gather the im2col
            # slab for output positions wp*pool + p (contiguous tk*C lane
            # windows of the padded activation), do ONE matmul, then take the
            # elementwise max across phases.
            best = None
            for p in range(pool):
                for wp in range(Wp):
                    s = (off + p + wp * pool) * C
                    slab_scr[wp * TR:(wp + 1) * TR, 0:K] = act_scr[:, s:s + K]
                y = jnp.dot(slab_scr[:, 0:K], w_refs[bi][...],
                            preferred_element_type=jnp.float32)   # (Wp*TR, ob)
                best = y if p == 0 else jnp.maximum(best, y)

            res = best + b_refs[bi][...]            # bias after max (equivalent)
            out_ref[:, :, c0:c0 + ob] = res.reshape(Wp, TR, ob)
            c0 += ob

    return kernel


def _pick_row_tile(n_rows, per_row_bytes, target_bytes=8 << 20):
    """Largest multiple-of-16 divisor of n_rows within a VMEM working-set budget."""
    budget = max(16, target_bytes // max(per_row_bytes, 1))
    if n_rows <= budget:
        return n_rows
    cands = [c for c in range(16, n_rows, 16) if n_rows % c == 0 and c <= budget]
    return max(cands) if cands else n_rows


def init_params(key, in_features, out_features=None, max_span=31):
    if out_features is None:
        out_features = in_features
    t3 = max_span + 1 - max_span % 2
    t2 = t3 // 2 + 1 - (t3 // 2) % 2
    t1 = t3 // 10 + 1 - (t3 // 10) % 2
    taps = (t1, t2, t3)
    out_chs = (max(1, out_features - 2 * (out_features // 3)),
               max(1, out_features // 3),
               max(1, out_features // 3))
    C = in_features
    params = {"taps": taps, "out_chs": out_chs, "bn": [], "conv_w": [], "conv_b": []}
    for bi in range(3):
        key, k1, k2, k3, k4, k5, k6 = jax.random.split(key, 7)
        gamma = jax.random.uniform(k1, (C,), jnp.float32, 0.5, 1.5)
        beta = 0.1 * jax.random.normal(k2, (C,), jnp.float32)
        mean = 0.1 * jax.random.normal(k3, (C,), jnp.float32)
        var = jax.random.uniform(k4, (C,), jnp.float32, 0.5, 1.5)
        tk, ob = taps[bi], out_chs[bi]
        bound = 1.0 / np.sqrt(C * tk)
        w = jax.random.uniform(k5, (ob, C, 1, tk), jnp.float32, -bound, bound)
        b = jax.random.uniform(k6, (ob,), jnp.float32, -bound, bound)
        params["bn"].append((gamma, beta, mean, var))
        params["conv_w"].append(w)
        params["conv_b"].append(b)
    return params


def temporal_transition_forward(x_nchw, params, pooling=2, row_tile=None,
                                input_dtype=jnp.bfloat16):
    N, C, H, W = x_nchw.shape
    taps, out_chs = params["taps"], params["out_chs"]
    t3 = taps[2]
    pad = t3 // 2
    Wpad = W + 2 * pad
    Wp = W // pooling
    OT = sum(out_chs)
    R = N * H

    # Fold BatchNorm (inference) into per-channel scale/shift, one row per branch,
    # tiled along time so it broadcasts against the lane-flattened (rows, W*C) tile.
    scales, shifts = [], []
    for gamma, beta, mean, var in params["bn"]:
        s = gamma / jnp.sqrt(var + BN_EPS)
        scales.append(s)
        shifts.append(beta - mean * s)
    scale_wc = jnp.tile(jnp.stack(scales), (1, W))   # (3, W*C), col w*C + c -> s[c]
    shift_wc = jnp.tile(jnp.stack(shifts), (1, W))

    # Conv weights (Ob, C, 1, tk) -> im2col matrices (tk*C, Ob); biases -> (1, Ob).
    ws = [jnp.transpose(w[:, :, 0, :], (2, 1, 0)).reshape(taps[i] * C, out_chs[i])
          .astype(jnp.float32) for i, w in enumerate(params["conv_w"])]
    bs = [b.reshape(1, -1).astype(jnp.float32) for b in params["conv_b"]]

    # Lane-flattened input: (N, C, H, W) -> (N*H, W*C), bf16 to halve HBM traffic.
    x2d = jnp.transpose(x_nchw, (0, 2, 3, 1)).reshape(R, W * C).astype(input_dtype)

    # Row-tile heuristic (kept well under v7x's 64 MiB VMEM, double-buffering included).
    per_row = (2 * 2 * W * C            # bf16 input tile, x2 buffers
               + 2 * 4 * Wp * OT        # f32 output tile, x2 buffers
               + 4 * Wpad * C           # padded-activation scratch
               + 3 * 4 * Wp * t3 * C)   # im2col slab scratch + temporaries margin
    TR = _pick_row_tile(R, per_row) if row_tile is None else row_tile
    assert R % TR == 0, (R, TR)
    grid = (R // TR,)
    vmem_limit = int(min(max(2 * TR * per_row + (4 << 20), 32 << 20), 48 << 20))

    kernel = make_temporal_transition_kernel(TR, W, C, Wp, pad, taps, out_chs, pooling)

    out3 = pl.pallas_call(
        kernel,
        out_shape=jax.ShapeDtypeStruct((Wp, R, OT), jnp.float32),
        grid=grid,
        in_specs=[
            pl.BlockSpec((TR, W * C), lambda r: (r, 0)),                     # x tile
            pl.BlockSpec((3, W * C), lambda r: (0, 0)),                      # scale
            pl.BlockSpec((3, W * C), lambda r: (0, 0)),                      # shift
            pl.BlockSpec((taps[0] * C, out_chs[0]), lambda r: (0, 0)),       # w1
            pl.BlockSpec((1, out_chs[0]), lambda r: (0, 0)),                 # b1
            pl.BlockSpec((taps[1] * C, out_chs[1]), lambda r: (0, 0)),       # w2
            pl.BlockSpec((1, out_chs[1]), lambda r: (0, 0)),                 # b2
            pl.BlockSpec((taps[2] * C, out_chs[2]), lambda r: (0, 0)),       # w3
            pl.BlockSpec((1, out_chs[2]), lambda r: (0, 0)),                 # b3
        ],
        out_specs=pl.BlockSpec((Wp, TR, OT), lambda r: (0, r, 0)),
        scratch_shapes=[
            pltpu.VMEM((TR, Wpad * C), jnp.float32),        # padded activation
            pltpu.VMEM((Wp * TR, taps[2] * C), jnp.float32),  # im2col slab (max K)
        ],
        compiler_params=pltpu.CompilerParams(
            dimension_semantics=("parallel",),
            vmem_limit_bytes=vmem_limit),
    )(x2d, scale_wc, shift_wc, ws[0], bs[0], ws[1], bs[1], ws[2], bs[2])

    # (Wp, N*H, OT) -> (N, OT, H, Wp)  (NCHW)
    return jnp.transpose(out3.reshape(Wp, N, H, OT), (1, 3, 2, 0))


def temporal_transition_reference(x, params, pooling=2):
    """Pure-JAX reference mirroring the PyTorch forward (inference-mode BN)."""
    N, C, H, W = x.shape
    taps = params["taps"]
    outs = []
    for bi in range(3):
        gamma, beta, mean, var = params["bn"][bi]
        s = (gamma / jnp.sqrt(var + BN_EPS))[None, :, None, None]
        sh = beta[None, :, None, None] - mean[None, :, None, None] * s
        a = x * s + sh
        a = jnp.where(a >= 0, a, LEAKY_SLOPE * a)
        tk = taps[bi]
        y = lax.conv_general_dilated(
            a, params["conv_w"][bi], window_strides=(1, 1),
            padding=((0, 0), (tk // 2, tk // 2)),
            dimension_numbers=("NCHW", "OIHW", "NCHW"),
            precision=lax.Precision.HIGHEST)
        y = y + params["conv_b"][bi][None, :, None, None]
        outs.append(y)
    y = jnp.concatenate(outs, axis=1)
    Wp = W // pooling
    y = y[:, :, :, :Wp * pooling].reshape(N, y.shape[1], H, Wp, pooling)
    return jnp.max(y, axis=-1)


if __name__ == "__main__":
    key = jax.random.PRNGKey(0)
    kx, kp = jax.random.split(key)
    N, C, H, W = 2, 4, 16, 16          # (batch, in_features, EEG channels, time)
    x = jax.random.normal(kx, (N, C, H, W), jnp.float32)
    params = init_params(kp, in_features=C)   # out_features defaults to in_features

    # row_tile=16 forces a 2-step grid even at this tiny size so the pipelined
    # BlockSpec path (and its index_maps) is actually exercised.
    out = temporal_transition_forward(x, params, pooling=2, row_tile=16)
    out = jax.block_until_ready(out)

    ref = temporal_transition_reference(x, params, pooling=2)
    assert out.shape == ref.shape, (out.shape, ref.shape)
    err = float(jnp.max(jnp.abs(out - ref)))
    assert err < 5e-2, f"max abs diff too large: {err}"
    print("KERNEL_OK")
</pallas_src>

<mosaic_0001>
module attributes {stable_mosaic.version = 11 : i64} {
  func.func @kernel(%arg0: i32, %arg1: memref<16x64xbf16, #tpu.memory_space<vmem>>, %arg2: memref<3x64xf32, #tpu.memory_space<vmem>>, %arg3: memref<3x64xf32, #tpu.memory_space<vmem>>, %arg4: memref<12x2xf32, #tpu.memory_space<vmem>>, %arg5: memref<1x2xf32, #tpu.memory_space<vmem>>, %arg6: memref<60x1xf32, #tpu.memory_space<vmem>>, %arg7: memref<1x1xf32, #tpu.memory_space<vmem>>, %arg8: memref<124x1xf32, #tpu.memory_space<vmem>>, %arg9: memref<1x1xf32, #tpu.memory_space<vmem>>, %arg10: memref<8x16x4xf32, #tpu.memory_space<vmem>>, %arg11: memref<16x184xf32, #tpu.memory_space<vmem>>, %arg12: memref<128x124xf32, #tpu.memory_space<vmem>>) attributes {dimension_semantics = [#tpu.dimension_semantics<parallel>], iteration_bounds = array<i64: 2>, scalar_prefetch = 0 : i64, scratch_operands = 2 : i64, tpu.core_type = #tpu.core_type<tc>, window_params = [{transform_indices = @transform_0, window_bounds = array<i64: 16, 64>}, {pipeline_mode = #tpu.pipeline_mode<synchronous>, transform_indices = @transform_1, window_bounds = array<i64: 3, 64>}, {pipeline_mode = #tpu.pipeline_mode<synchronous>, transform_indices = @transform_2, window_bounds = array<i64: 3, 64>}, {pipeline_mode = #tpu.pipeline_mode<synchronous>, transform_indices = @transform_3, window_bounds = array<i64: 12, 2>}, {pipeline_mode = #tpu.pipeline_mode<synchronous>, transform_indices = @transform_4, window_bounds = array<i64: 1, 2>}, {pipeline_mode = #tpu.pipeline_mode<synchronous>, transform_indices = @transform_5, window_bounds = array<i64: 60, 1>}, {pipeline_mode = #tpu.pipeline_mode<synchronous>, transform_indices = @transform_6, window_bounds = array<i64: 1, 1>}, {pipeline_mode = #tpu.pipeline_mode<synchronous>, transform_indices = @transform_7, window_bounds = array<i64: 124, 1>}, {pipeline_mode = #tpu.pipeline_mode<synchronous>, transform_indices = @transform_8, window_bounds = array<i64: 1, 1>}, {transform_indices = @transform_9, window_bounds = array<i64: 8, 16, 4>}]} {
    %c0 = arith.constant 0 : index
    %c0_0 = arith.constant 0 : index
    %0 = vector.load %arg1[%c0, %c0_0] : memref<16x64xbf16, #tpu.memory_space<vmem>>, vector<16x64xbf16>
    %1 = arith.extf %0 : vector<16x64xbf16> to vector<16x64xf32>
    %cst = arith.constant 0.000000e+00 : f32
    %2 = vector.broadcast %cst : f32 to vector<16x60xf32>
    %c0_1 = arith.constant 0 : index
    %c0_2 = arith.constant 0 : index
    %3 = vector.load %arg11[%c0_1, %c0_2] : memref<16x184xf32, #tpu.memory_space<vmem>>, vector<16x60xf32>
    tpu.vector_store %arg11[%c0_1, %c0_2], %2 {strides = array<i32>} : memref<16x184xf32, #tpu.memory_space<vmem>>, vector<16x60xf32>,
    %c0_3 = arith.constant 0 : index
    %c124 = arith.constant 124 : index
    %4 = vector.load %arg11[%c0_3, %c124] : memref<16x184xf32, #tpu.memory_space<vmem>>, vector<16x60xf32>
    tpu.vector_store %arg11[%c0_3, %c124], %2 {strides = array<i32>} : memref<16x184xf32, #tpu.memory_space<vmem>>, vector<16x60xf32>,
    %c0_4 = arith.constant 0 : index
    %c0_5 = arith.constant 0 : index
    %5 = vector.load %arg2[%c0_4, %c0_5] : memref<3x64xf32, #tpu.memory_space<vmem>>, vector<1x64xf32>
    %6 = vector.broadcast %5 : vector<1x64xf32> to vector<16x64xf32>
    %7 = arith.mulf %1, %6 : vector<16x64xf32>
    %c0_6 = arith.constant 0 : index
    %c0_7 = arith.constant 0 : index
    %8 = vector.load %arg3[%c0_6, %c0_7] : memref<3x64xf32, #tpu.memory_space<vmem>>, vector<1x64xf32>
    %9 = vector.broadcast %8 : vector<1x64xf32> to vector<16x64xf32>
    %10 = arith.addf %7, %9 : vector<16x64xf32>
    %cst_8 = arith.constant 0.000000e+00 : f32
    %11 = vector.broadcast %cst_8 : f32 to vector<16x64xf32>
    %12 = arith.cmpf oge, %10, %11 : vector<16x64xf32>
    %cst_9 = arith.constant 0.00999999977 : f32
    %13 = vector.broadcast %cst_9 : f32 to vector<16x64xf32>
    %14 = arith.mulf %13, %10 : vector<16x64xf32>
    %15 = arith.select %12, %10, %14 : vector<16x64xi1>, vector<16x64xf32>
    %c0_10 = arith.constant 0 : index
    %c60 = arith.constant 60 : index
    %16 = vector.load %arg11[%c0_10, %c60] : memref<16x184xf32, #tpu.memory_space<vmem>>, vector<16x64xf32>
    tpu.vector_store %arg11[%c0_10, %c60], %15 {strides = array<i32>} : memref<16x184xf32, #tpu.memory_space<vmem>>, vector<16x64xf32>,
    %c0_11 = arith.constant 0 : index
    %c56 = arith.constant 56 : index
    %17 = vector.load %arg11[%c0_11, %c56] : memref<16x184xf32, #tpu.memory_space<vmem>>, vector<16x12xf32>
    %c0_12 = arith.constant 0 : index
    %c0_13 = arith.constant 0 : index
    %18 = vector.load %arg12[%c0_12, %c0_13] : memref<128x124xf32, #tpu.memory_space<vmem>>, vector<16x12xf32>
    tpu.vector_store %arg12[%c0_12, %c0_13], %17 {strides = array<i32>} : memref<128x124xf32, #tpu.memory_space<vmem>>, vector<16x12xf32>,
    %c0_14 = arith.constant 0 : index
    %c64 = arith.constant 64 : index
    %19 = vector.load %arg11[%c0_14, %c64] : memref<16x184xf32, #tpu.memory_space<vmem>>, vector<16x12xf32>
    %c16 = arith.constant 16 : index
    %c0_15 = arith.constant 0 : index
    %20 = vector.load %arg12[%c16, %c0_15] : memref<128x124xf32, #tpu.memory_space<vmem>>, vector<16x12xf32>
    tpu.vector_store %arg12[%c16, %c0_15], %19 {strides = array<i32>} : memref<128x124xf32, #tpu.memory_space<vmem>>, vector<16x12xf32>,
    %c0_16 = arith.constant 0 : index
    %c72 = arith.constant 72 : index
    %21 = vector.load %arg11[%c0_16, %c72] : memref<16x184xf32, #tpu.memory_space<vmem>>, vector<16x12xf32>
    %c32 = arith.constant 32 : index
    %c0_17 = arith.constant 0 : index
    %22 = vector.load %arg12[%c32, %c0_17] : memref<128x124xf32, #tpu.memory_space<vmem>>, vector<16x12xf32>
    tpu.vector_store %arg12[%c32, %c0_17], %21 {strides = array<i32>} : memref<128x124xf32, #tpu.memory_space<vmem>>, vector<16x12xf32>,
    %c0_18 = arith.constant 0 : index
    %c80 = arith.constant 80 : index
    %23 = vector.load %arg11[%c0_18, %c80] : memref<16x184xf32, #tpu.memory_space<vmem>>, vector<16x12xf32>
    %c48 = arith.constant 48 : index
    %c0_19 = arith.constant 0 : index
    %24 = vector.load %arg12[%c48, %c0_19] : memref<128x124xf32, #tpu.memory_space<vmem>>, vector<16x12xf32>
    tpu.vector_store %arg12[%c48, %c0_19], %23 {strides = array<i32>} : memref<128x124xf32, #tpu.memory_space<vmem>>, vector<16x12xf32>,
    %c0_20 = arith.constant 0 : index
    %c88 = arith.constant 88 : index
    %25 = vector.load %arg11[%c0_20, %c88] : memref<16x184xf32, #tpu.memory_space<vmem>>, vector<16x12xf32>
    %c64_21 = arith.constant 64 : index
    %c0_22 = arith.constant 0 : index
    %26 = vector.load %arg12[%c64_21, %c0_22] : memref<128x124xf32, #tpu.memory_space<vmem>>, vector<16x12xf32>
    tpu.vector_store %arg12[%c64_21, %c0_22], %25 {strides = array<i32>} : memref<128x124xf32, #tpu.memory_space<vmem>>, vector<16x12xf32>,
    %c0_23 = arith.constant 0 : index
    %c96 = arith.constant 96 : index
    %27 = vector.load %arg11[%c0_23, %c96] : memref<16x184xf32, #tpu.memory_space<vmem>>, vector<16x12xf32>
    %c80_24 = arith.constant 80 : index
    %c0_25 = arith.constant 0 : index
    %28 = vector.load %arg12[%c80_24, %c0_25] : memref<128x124xf32, #tpu.memory_space<vmem>>, vector<16x12xf32>
    tpu.vector_store %arg12[%c80_24, %c0_25], %27 {strides = array<i32>} : memref<128x124xf32, #tpu.memory_space<vmem>>, vector<16x12xf32>,
    %c0_26 = arith.constant 0 : index
    %c104 = arith.constant 104 : index
    %29 = vector.load %arg11[%c0_26, %c104] : memref<16x184xf32, #tpu.memory_space<vmem>>, vector<16x12xf32>
    %c96_27 = arith.constant 96 : index
    %c0_28 = arith.constant 0 : index
    %30 = vector.load %arg12[%c96_27, %c0_28] : memref<128x124xf32, #tpu.memory_space<vmem>>, vector<16x12xf32>
    tpu.vector_store %arg12[%c96_27, %c0_28], %29 {strides = array<i32>} : memref<128x124xf32, #tpu.memory_space<vmem>>, vector<16x12xf32>,
    %c0_29 = arith.constant 0 : index
    %c112 = arith.constant 112 : index
    %31 = vector.load %arg11[%c0_29, %c112] : memref<16x184xf32, #tpu.memory_space<vmem>>, vector<16x12xf32>
    %c112_30 = arith.constant 112 : index
    %c0_31 = arith.constant 0 : index
    %32 = vector.load %arg12[%c112_30, %c0_31] : memref<128x124xf32, #tpu.memory_space<vmem>>, vector<16x12xf32>
    tpu.vector_store %arg12[%c112_30, %c0_31], %31 {strides = array<i32>} : memref<128x124xf32, #tpu.memory_space<vmem>>, vector<16x12xf32>,
    %c0_32 = arith.constant 0 : index
    %c0_33 = arith.constant 0 : index
    %33 = vector.load %arg12[%c0_32, %c0_33] : memref<128x124xf32, #tpu.memory_space<vmem>>, vector<128x12xf32>
    %c0_34 = arith.constant 0 : index
    %c0_35 = arith.constant 0 : index
    %34 = vector.load %arg4[%c0_34, %c0_35] : memref<12x2xf32, #tpu.memory_space<vmem>>, vector<12x2xf32>
    %cst_36 = arith.constant dense<0.000000e+00> : vector<128x2xf32>
    %35 = tpu.matmul %33, %34, %cst_36 {dimension_numbers = #tpu.dot_dimension_numbers<[1], [0], [0], [1], [0, 0, 1, 1], [], []>} : vector<128x12xf32>, vector<12x2xf32>, vector<128x2xf32> -> vector<128x2xf32>
    %c0_37 = arith.constant 0 : index
    %c60_38 = arith.constant 60 : index
    %36 = vector.load %arg11[%c0_37, %c60_38] : memref<16x184xf32, #tpu.memory_space<vmem>>, vector<16x12xf32>
    %c0_39 = arith.constant 0 : index
    %c0_40 = arith.constant 0 : index
    %37 = vector.load %arg12[%c0_39, %c0_40] : memref<128x124xf32, #tpu.memory_space<vmem>>, vector<16x12xf32>
    tpu.vector_store %arg12[%c0_39, %c0_40], %36 {strides = array<i32>} : memref<128x124xf32, #tpu.memory_space<vmem>>, vector<16x12xf32>,
    %c0_41 = arith.constant 0 : index
    %c68 = arith.constant 68 : index
    %38 = vector.load %arg11[%c0_41, %c68] : memref<16x184xf32, #tpu.memory_space<vmem>>, vector<16x12xf32>
    %c16_42 = arith.constant 16 : index
    %c0_43 = arith.constant 0 : index
    %39 = vector.load %arg12[%c16_42, %c0_43] : memref<128x124xf32, #tpu.memory_space<vmem>>, vector<16x12xf32>
    tpu.vector_store %arg12[%c16_42, %c0_43], %38 {strides = array<i32>} : memref<128x124xf32, #tpu.memory_space<vmem>>, vector<16x12xf32>,
    %c0_44 = arith.constant 0 : index
    %c76 = arith.constant 76 : index
    %40 = vector.load %arg11[%c0_44, %c76] : memref<16x184xf32, #tpu.memory_space<vmem>>, vector<16x12xf32>
    %c32_45 = arith.constant 32 : index
    %c0_46 = arith.constant 0 : index
    %41 = vector.load %arg12[%c32_45, %c0_46] : memref<128x124xf32, #tpu.memory_space<vmem>>, vector<16x12xf32>
    tpu.vector_store %arg12[%c32_45, %c0_46], %40 {strides = array<i32>} : memref<128x124xf32, #tpu.memory_space<vmem>>, vector<16x12xf32>,
    %c0_47 = arith.constant 0 : index
    %c84 = arith.constant 84 : index
    %42 = vector.load %arg11[%c0_47, %c84] : memref<16x184xf32, #tpu.memory_space<vmem>>, vector<16x12xf32>
    %c48_48 = arith.constant 48 : index
    %c0_49 = arith.constant 0 : index
    %43 = vector.load %arg12[%c48_48, %c0_49] : memref<128x124xf32, #tpu.memory_space<vmem>>, vector<16x12xf32>
    tpu.vector_store %arg12[%c48_48, %c0_49], %42 {strides = array<i32>} : memref<128x124xf32, #tpu.memory_space<vmem>>, vector<16x12xf32>,
    %c0_50 = arith.constant 0 : index
    %c92 = arith.constant 92 : index
    %44 = vector.load %arg11[%c0_50, %c92] : memref<16x184xf32, #tpu.memory_space<vmem>>, vector<16x12xf32>
    %c64_51 = arith.constant 64 : index
    %c0_52 = arith.constant 0 : index
    %45 = vector.load %arg12[%c64_51, %c0_52] : memref<128x124xf32, #tpu.memory_space<vmem>>, vector<16x12xf32>
    tpu.vector_store %arg12[%c64_51, %c0_52], %44 {strides = array<i32>} : memref<128x124xf32, #tpu.memory_space<vmem>>, vector<16x12xf32>,
    %c0_53 = arith.constant 0 : index
    %c100 = arith.constant 100 : index
    %46 = vector.load %arg11[%c0_53, %c100] : memref<16x184xf32, #tpu.memory_space<vmem>>, vector<16x12xf32>
    %c80_54 = arith.constant 80 : index
    %c0_55 = arith.constant 0 : index
    %47 = vector.load %arg12[%c80_54, %c0_55] : memref<128x124xf32, #tpu.memory_space<vmem>>, vector<16x12xf32>
    tpu.vector_store %arg12[%c80_54, %c0_55], %46 {strides = array<i32>} : memref<128x124xf32, #tpu.memory_space<vmem>>, vector<16x12xf32>,
    %c0_56 = arith.constant 0 : index
    %c108 = arith.constant 108 : index
    %48 = vector.load %arg11[%c0_56, %c108] : memref<16x184xf32, #tpu.memory_space<vmem>>, vector<16x12xf32>
    %c96_57 = arith.constant 96 : index
    %c0_58 = arith.constant 0 : index
    %49 = vector.load %arg12[%c96_57, %c0_58] : memref<128x124xf32, #tpu.memory_space<vmem>>, vector<16x12xf32>
    tpu.vector_store %arg12[%c96_57, %c0_58], %48 {strides = array<i32>} : memref<128x124xf32, #tpu.memory_space<vmem>>, vector<16x12xf32>,
    %c0_59 = arith.constant 0 : index
    %c116 = arith.constant 116 : index
    %50 = vector.load %arg11[%c0_59, %c116] : memref<16x184xf32, #tpu.memory_space<vmem>>, vector<16x12xf32>
    %c112_60 = arith.constant 112 : index
    %c0_61 = arith.constant 0 : index
    %51 = vector.load %arg12[%c112_60, %c0_61] : memref<128x124xf32, #tpu.memory_space<vmem>>, vector<16x12xf32>
    tpu.vector_store %arg12[%c112_60, %c0_61], %50 {strides = array<i32>} : memref<128x124xf32, #tpu.memory_space<vmem>>, vector<16x12xf32>,
    %c0_62 = arith.constant 0 : index
    %c0_63 = arith.constant 0 : index
    %52 = vector.load %arg12[%c0_62, %c0_63] : memref<128x124xf32, #tpu.memory_space<vmem>>, vector<128x12xf32>
    %c0_64 = arith.constant 0 : index
    %c0_65 = arith.constant 0 : index
    %53 = vector.load %arg4[%c0_64, %c0_65] : memref<12x2xf32, #tpu.memory_space<vmem>>, vector<12x2xf32>
    %cst_66 = arith.constant dense<0.000000e+00> : vector<128x2xf32>
    %54 = tpu.matmul %52, %53, %cst_66 {dimension_numbers = #tpu.dot_dimension_numbers<[1], [0], [0], [1], [0, 0, 1, 1], [], []>} : vector<128x12xf32>, vector<12x2xf32>, vector<128x2xf32> -> vector<128x2xf32>
    %55 = arith.maximumf %35, %54 : vector<128x2xf32>
    %c0_67 = arith.constant 0 : index
    %c0_68 = arith.constant 0 : index
    %56 = vector.load %arg5[%c0_67, %c0_68] : memref<1x2xf32, #tpu.memory_space<vmem>>, vector<1x2xf32>
    %57 = vector.broadcast %56 : vector<1x2xf32> to vector<128x2xf32>
    %58 = arith.addf %55, %57 : vector<128x2xf32>
    %59 = vector.shape_cast %58 : vector<128x2xf32> to vector<8x16x2xf32>
    %c0_69 = arith.constant 0 : index
    %c0_70 = arith.constant 0 : index
    %c0_71 = arith.constant 0 : index
    %60 = vector.load %arg10[%c0_69, %c0_70, %c0_71] : memref<8x16x4xf32, #tpu.memory_space<vmem>>, vector<8x16x2xf32>
    tpu.vector_store %arg10[%c0_69, %c0_70, %c0_71], %59 {strides = array<i32>} : memref<8x16x4xf32, #tpu.memory_space<vmem>>, vector<8x16x2xf32>,
    %c1 = arith.constant 1 : index
    %c0_72 = arith.constant 0 : index
    %61 = vector.load %arg2[%c1, %c0_72] : memref<3x64xf32, #tpu.memory_space<vmem>>, vector<1x64xf32>
    %62 = vector.broadcast %61 : vector<1x64xf32> to vector<16x64xf32>
    %63 = arith.mulf %1, %62 : vector<16x64xf32>
    %c1_73 = arith.constant 1 : index
    %c0_74 = arith.constant 0 : index
    %64 = vector.load %arg3[%c1_73, %c0_74] : memref<3x64xf32, #tpu.memory_space<vmem>>, vector<1x64xf32>
    %65 = vector.broadcast %64 : vector<1x64xf32> to vector<16x64xf32>
    %66 = arith.addf %63, %65 : vector<16x64xf32>
    %cst_75 = arith.constant 0.000000e+00 : f32
    %67 = vector.broadcast %cst_75 : f32 to vector<16x64xf32>
    %68 = arith.cmpf oge, %66, %67 : vector<16x64xf32>
    %cst_76 = arith.constant 0.00999999977 : f32
    %69 = vector.broadcast %cst_76 : f32 to vector<16x64xf32>
    %70 = arith.mulf %69, %66 : vector<16x64xf32>
    %71 = arith.select %68, %66, %70 : vector<16x64xi1>, vector<16x64xf32>
    %c0_77 = arith.constant 0 : index
    %c60_78 = arith.constant 60 : index
    %72 = vector.load %arg11[%c0_77, %c60_78] : memref<16x184xf32, #tpu.memory_space<vmem>>, vector<16x64xf32>
    tpu.vector_store %arg11[%c0_77, %c60_78], %71 {strides = array<i32>} : memref<16x184xf32, #tpu.memory_space<vmem>>, vector<16x64xf32>,
    %c0_79 = arith.constant 0 : index
    %c32_80 = arith.constant 32 : index
    %73 = vector.load %arg11[%c0_79, %c32_80] : memref<16x184xf32, #tpu.memory_space<vmem>>, vector<16x60xf32>
    %c0_81 = arith.constant 0 : index
    %c0_82 = arith.constant 0 : index
    %74 = vector.load %arg12[%c0_81, %c0_82] : memref<128x124xf32, #tpu.memory_space<vmem>>, vector<16x60xf32>
    tpu.vector_store %arg12[%c0_81, %c0_82], %73 {strides = array<i32>} : memref<128x124xf32, #tpu.memory_space<vmem>>, vector<16x60xf32>,
    %c0_83 = arith.constant 0 : index
    %c40 = arith.constant 40 : index
    %75 = vector.load %arg11[%c0_83, %c40] : memref<16x184xf32, #tpu.memory_space<vmem>>, vector<16x60xf32>
    %c16_84 = arith.constant 16 : index
    %c0_85 = arith.constant 0 : index
    %76 = vector.load %arg12[%c16_84, %c0_85] : memref<128x124xf32, #tpu.memory_space<vmem>>, vector<16x60xf32>
    tpu.vector_store %arg12[%c16_84, %c0_85], %75 {strides = array<i32>} : memref<128x124xf32, #tpu.memory_space<vmem>>, vector<16x60xf32>,
    %c0_86 = arith.constant 0 : index
    %c48_87 = arith.constant 48 : index
    %77 = vector.load %arg11[%c0_86, %c48_87] : memref<16x184xf32, #tpu.memory_space<vmem>>, vector<16x60xf32>
    %c32_88 = arith.constant 32 : index
    %c0_89 = arith.constant 0 : index
    %78 = vector.load %arg12[%c32_88, %c0_89] : memref<128x124xf32, #tpu.memory_space<vmem>>, vector<16x60xf32>
    tpu.vector_store %arg12[%c32_88, %c0_89], %77 {strides = array<i32>} : memref<128x124xf32, #tpu.memory_space<vmem>>, vector<16x60xf32>,
    %c0_90 = arith.constant 0 : index
    %c56_91 = arith.constant 56 : index
    %79 = vector.load %arg11[%c0_90, %c56_91] : memref<16x184xf32, #tpu.memory_space<vmem>>, vector<16x60xf32>
    %c48_92 = arith.constant 48 : index
    %c0_93 = arith.constant 0 : index
    %80 = vector.load %arg12[%c48_92, %c0_93] : memref<128x124xf32, #tpu.memory_space<vmem>>, vector<16x60xf32>
    tpu.vector_store %arg12[%c48_92, %c0_93], %79 {strides = array<i32>} : memref<128x124xf32, #tpu.memory_space<vmem>>, vector<16x60xf32>,
    %c0_94 = arith.constant 0 : index
    %c64_95 = arith.constant 64 : index
    %81 = vector.load %arg11[%c0_94, %c64_95] : memref<16x184xf32, #tpu.memory_space<vmem>>, vector<16x60xf32>
    %c64_96 = arith.constant 64 : index
    %c0_97 = arith.constant 0 : index
    %82 = vector.load %arg12[%c64_96, %c0_97] : memref<128x124xf32, #tpu.memory_space<vmem>>, vector<16x60xf32>
    tpu.vector_store %arg12[%c64_96, %c0_97], %81 {strides = array<i32>} : memref<128x124xf32, #tpu.memory_space<vmem>>, vector<16x60xf32>,
    %c0_98 = arith.constant 0 : index
    %c72_99 = arith.constant 72 : index
    %83 = vector.load %arg11[%c0_98, %c72_99] : memref<16x184xf32, #tpu.memory_space<vmem>>, vector<16x60xf32>
    %c80_100 = arith.constant 80 : index
    %c0_101 = arith.constant 0 : index
    %84 = vector.load %arg12[%c80_100, %c0_101] : memref<128x124xf32, #tpu.memory_space<vmem>>, vector<16x60xf32>
    tpu.vector_store %arg12[%c80_100, %c0_101], %83 {strides = array<i32>} : memref<128x124xf32, #tpu.memory_space<vmem>>, vector<16x60xf32>,
    %c0_102 = arith.constant 0 : index
    %c80_103 = arith.constant 80 : index
    %85 = vector.load %arg11[%c0_102, %c80_103] : memref<16x184xf32, #tpu.memory_space<vmem>>, vector<16x60xf32>
    %c96_104 = arith.constant 96 : index
    %c0_105 = arith.constant 0 : index
    %86 = vector.load %arg12[%c96_104, %c0_105] : memref<128x124xf32, #tpu.memory_space<vmem>>, vector<16x60xf32>
    tpu.vector_store %arg12[%c96_104, %c0_105], %85 {strides = array<i32>} : memref<128x124xf32, #tpu.memory_space<vmem>>, vector<16x60xf32>,
    %c0_106 = arith.constant 0 : index
    %c88_107 = arith.constant 88 : index
    %87 = vector.load %arg11[%c0_106, %c88_107] : memref<16x184xf32, #tpu.memory_space<vmem>>, vector<16x60xf32>
    %c112_108 = arith.constant 112 : index
    %c0_109 = arith.constant 0 : index
    %88 = vector.load %arg12[%c112_108, %c0_109] : memref<128x124xf32, #tpu.memory_space<vmem>>, vector<16x60xf32>
    tpu.vector_store %arg12[%c112_108, %c0_109], %87 {strides = array<i32>} : memref<128x124xf32, #tpu.memory_space<vmem>>, vector<16x60xf32>,
    %c0_110 = arith.constant 0 : index
    %c0_111 = arith.constant 0 : index
    %89 = vector.load %arg12[%c0_110, %c0_111] : memref<128x124xf32, #tpu.memory_space<vmem>>, vector<128x60xf32>
    %c0_112 = arith.constant 0 : index
    %c0_113 = arith.constant 0 : index
    %90 = vector.load %arg6[%c0_112, %c0_113] : memref<60x1xf32, #tpu.memory_space<vmem>>, vector<60x1xf32>
    %cst_114 = arith.constant dense<0.000000e+00> : vector<128x1xf32>
    %91 = tpu.matmul %89, %90, %cst_114 {dimension_numbers = #tpu.dot_dimension_numbers<[1], [0], [0], [1], [0, 0, 1, 1], [], []>} : vector<128x60xf32>, vector<60x1xf32>, vector<128x1xf32> -> vector<128x1xf32>
    %c0_115 = arith.constant 0 : index
    %c36 = arith.constant 36 : index
    %92 = vector.load %arg11[%c0_115, %c36] : memref<16x184xf32, #tpu.memory_space<vmem>>, vector<16x60xf32>
    %c0_116 = arith.constant 0 : index
    %c0_117 = arith.constant 0 : index
    %93 = vector.load %arg12[%c0_116, %c0_117] : memref<128x124xf32, #tpu.memory_space<vmem>>, vector<16x60xf32>
    tpu.vector_store %arg12[%c0_116, %c0_117], %92 {strides = array<i32>} : memref<128x124xf32, #tpu.memory_space<vmem>>, vector<16x60xf32>,
    %c0_118 = arith.constant 0 : index
    %c44 = arith.constant 44 : index
    %94 = vector.load %arg11[%c0_118, %c44] : memref<16x184xf32, #tpu.memory_space<vmem>>, vector<16x60xf32>
    %c16_119 = arith.constant 16 : index
    %c0_120 = arith.constant 0 : index
    %95 = vector.load %arg12[%c16_119, %c0_120] : memref<128x124xf32, #tpu.memory_space<vmem>>, vector<16x60xf32>
    tpu.vector_store %arg12[%c16_119, %c0_120], %94 {strides = array<i32>} : memref<128x124xf32, #tpu.memory_space<vmem>>, vector<16x60xf32>,
    %c0_121 = arith.constant 0 : index
    %c52 = arith.constant 52 : index
    %96 = vector.load %arg11[%c0_121, %c52] : memref<16x184xf32, #tpu.memory_space<vmem>>, vector<16x60xf32>
    %c32_122 = arith.constant 32 : index
    %c0_123 = arith.constant 0 : index
    %97 = vector.load %arg12[%c32_122, %c0_123] : memref<128x124xf32, #tpu.memory_space<vmem>>, vector<16x60xf32>
    tpu.vector_store %arg12[%c32_122, %c0_123], %96 {strides = array<i32>} : memref<128x124xf32, #tpu.memory_space<vmem>>, vector<16x60xf32>,
    %c0_124 = arith.constant 0 : index
    %c60_125 = arith.constant 60 : index
    %98 = vector.load %arg11[%c0_124, %c60_125] : memref<16x184xf32, #tpu.memory_space<vmem>>, vector<16x60xf32>
    %c48_126 = arith.constant 48 : index
    %c0_127 = arith.constant 0 : index
    %99 = vector.load %arg12[%c48_126, %c0_127] : memref<128x124xf32, #tpu.memory_space<vmem>>, vector<16x60xf32>
    tpu.vector_store %arg12[%c48_126, %c0_127], %98 {strides = array<i32>} : memref<128x124xf32, #tpu.memory_space<vmem>>, vector<16x60xf32>,
    %c0_128 = arith.constant 0 : index
    %c68_129 = arith.constant 68 : index
    %100 = vector.load %arg11[%c0_128, %c68_129] : memref<16x184xf32, #tpu.memory_space<vmem>>, vector<16x60xf32>
    %c64_130 = arith.constant 64 : index
    %c0_131 = arith.constant 0 : index
    %101 = vector.load %arg12[%c64_130, %c0_131] : memref<128x124xf32, #tpu.memory_space<vmem>>, vector<16x60xf32>
    tpu.vector_store %arg12[%c64_130, %c0_131], %100 {strides = array<i32>} : memref<128x124xf32, #tpu.memory_space<vmem>>, vector<16x60xf32>,
    %c0_132 = arith.constant 0 : index
    %c76_133 = arith.constant 76 : index
    %102 = vector.load %arg11[%c0_132, %c76_133] : memref<16x184xf32, #tpu.memory_space<vmem>>, vector<16x60xf32>
    %c80_134 = arith.constant 80 : index
    %c0_135 = arith.constant 0 : index
    %103 = vector.load %arg12[%c80_134, %c0_135] : memref<128x124xf32, #tpu.memory_space<vmem>>, vector<16x60xf32>
    tpu.vector_store %arg12[%c80_134, %c0_135], %102 {strides = array<i32>} : memref<128x124xf32, #tpu.memory_space<vmem>>, vector<16x60xf32>,
    %c0_136 = arith.constant 0 : index
    %c84_137 = arith.constant 84 : index
    %104 = vector.load %arg11[%c0_136, %c84_137] : memref<16x184xf32, #tpu.memory_space<vmem>>, vector<16x60xf32>
    %c96_138 = arith.constant 96 : index
    %c0_139 = arith.constant 0 : index
    %105 = vector.load %arg12[%c96_138, %c0_139] : memref<128x124xf32, #tpu.memory_space<vmem>>, vector<16x60xf32>
    tpu.vector_store %arg12[%c96_138, %c0_139], %104 {strides = array<i32>} : memref<128x124xf32, #tpu.memory_space<vmem>>, vector<16x60xf32>,
    %c0_140 = arith.constant 0 : index
    %c92_141 = arith.constant 92 : index
    %106 = vector.load %arg11[%c0_140, %c92_141] : memref<16x184xf32, #tpu.memory_space<vmem>>, vector<16x60xf32>
    %c112_142 = arith.constant 112 : index
    %c0_143 = arith.constant 0 : index
    %107 = vector.load %arg12[%c112_142, %c0_143] : memref<128x124xf32, #tpu.memory_space<vmem>>, vector<16x60xf32>
    tpu.vector_store %arg12[%c112_142, %c0_143], %106 {strides = array<i32>} : memref<128x124xf32, #tpu.memory_space<vmem>>, vector<16x60xf32>,
    %c0_144 = arith.constant 0 : index
    %c0_145 = arith.constant 0 : index
    %108 = vector.load %arg12[%c0_144, %c0_145] : memref<128x124xf32, #tpu.memory_space<vmem>>, vector<128x60xf32>
    %c0_146 = arith.constant 0 : index
    %c0_147 = arith.constant 0 : index
    %109 = vector.load %arg6[%c0_146, %c0_147] : memref<60x1xf32, #tpu.memory_space<vmem>>, vector<60x1xf32>
    %cst_148 = arith.constant dense<0.000000e+00> : vector<128x1xf32>
    %110 = tpu.matmul %108, %109, %cst_148 {dimension_numbers = #tpu.dot_dimension_numbers<[1], [0], [0], [1], [0, 0, 1, 1], [], []>} : vector<128x60xf32>, vector<60x1xf32>, vector<128x1xf32> -> vector<128x1xf32>
    %111 = arith.maximumf %91, %110 : vector<128x1xf32>
    %c0_149 = arith.constant 0 : index
    %c0_150 = arith.constant 0 : index
    %112 = vector.load %arg7[%c0_149, %c0_150] : memref<1x1xf32, #tpu.memory_space<vmem>>, vector<1x1xf32>
    %113 = vector.broadcast %112 : vector<1x1xf32> to vector<128x1xf32>
    %114 = arith.addf %111, %113 : vector<128x1xf32>
    %115 = vector.shape_cast %114 : vector<128x1xf32> to vector<8x16x1xf32>
    %c0_151 = arith.constant 0 : index
    %c0_152 = arith.constant 0 : index
    %c2 = arith.constant 2 : index
    %116 = vector.load %arg10[%c0_151, %c0_152, %c2] : memref<8x16x4xf32, #tpu.memory_space<vmem>>, vector<8x16x1xf32>
    tpu.vector_store %arg10[%c0_151, %c0_152, %c2], %115 {strides = array<i32>} : memref<8x16x4xf32, #tpu.memory_space<vmem>>, vector<8x16x1xf32>,
    %c2_153 = arith.constant 2 : index
    %c0_154 = arith.constant 0 : index
    %117 = vector.load %arg2[%c2_153, %c0_154] : memref<3x64xf32, #tpu.memory_space<vmem>>, vector<1x64xf32>
    %118 = vector.broadcast %117 : vector<1x64xf32> to vector<16x64xf32>
    %119 = arith.mulf %1, %118 : vector<16x64xf32>
    %c2_155 = arith.constant 2 : index
    %c0_156 = arith.constant 0 : index
    %120 = vector.load %arg3[%c2_155, %c0_156] : memref<3x64xf32, #tpu.memory_space<vmem>>, vector<1x64xf32>
    %121 = vector.broadcast %120 : vector<1x64xf32> to vector<16x64xf32>
    %122 = arith.addf %119, %121 : vector<16x64xf32>
    %cst_157 = arith.constant 0.000000e+00 : f32
    %123 = vector.broadcast %cst_157 : f32 to vector<16x64xf32>
    %124 = arith.cmpf oge, %122, %123 : vector<16x64xf32>
    %cst_158 = arith.constant 0.00999999977 : f32
    %125 = vector.broadcast %cst_158 : f32 to vector<16x64xf32>
    %126 = arith.mulf %125, %122 : vector<16x64xf32>
    %127 = arith.select %124, %122, %126 : vector<16x64xi1>, vector<16x64xf32>
    %c0_159 = arith.constant 0 : index
    %c60_160 = arith.constant 60 : index
    %128 = vector.load %arg11[%c0_159, %c60_160] : memref<16x184xf32, #tpu.memory_space<vmem>>, vector<16x64xf32>
    tpu.vector_store %arg11[%c0_159, %c60_160], %127 {strides = array<i32>} : memref<16x184xf32, #tpu.memory_space<vmem>>, vector<16x64xf32>,
    %c0_161 = arith.constant 0 : index
    %c0_162 = arith.constant 0 : index
    %129 = vector.load %arg11[%c0_161, %c0_162] : memref<16x184xf32, #tpu.memory_space<vmem>>, vector<16x124xf32>
    %c0_163 = arith.constant 0 : index
    %c0_164 = arith.constant 0 : index
    %130 = vector.load %arg12[%c0_163, %c0_164] : memref<128x124xf32, #tpu.memory_space<vmem>>, vector<16x124xf32>
    tpu.vector_store %arg12[%c0_163, %c0_164], %129 {strides = array<i32>} : memref<128x124xf32, #tpu.memory_space<vmem>>, vector<16x124xf32>,
    %c0_165 = arith.constant 0 : index
    %c8 = arith.constant 8 : index
    %131 = vector.load %arg11[%c0_165, %c8] : memref<16x184xf32, #tpu.memory_space<vmem>>, vector<16x124xf32>
    %c16_166 = arith.constant 16 : index
    %c0_167 = arith.constant 0 : index
    %132 = vector.load %arg12[%c16_166, %c0_167] : memref<128x124xf32, #tpu.memory_space<vmem>>, vector<16x124xf32>
    tpu.vector_store %arg12[%c16_166, %c0_167], %131 {strides = array<i32>} : memref<128x124xf32, #tpu.memory_space<vmem>>, vector<16x124xf32>,
    %c0_168 = arith.constant 0 : index
    %c16_169 = arith.constant 16 : index
    %133 = vector.load %arg11[%c0_168, %c16_169] : memref<16x184xf32, #tpu.memory_space<vmem>>, vector<16x124xf32>
    %c32_170 = arith.constant 32 : index
    %c0_171 = arith.constant 0 : index
    %134 = vector.load %arg12[%c32_170, %c0_171] : memref<128x124xf32, #tpu.memory_space<vmem>>, vector<16x124xf32>
    tpu.vector_store %arg12[%c32_170, %c0_171], %133 {strides = array<i32>} : memref<128x124xf32, #tpu.memory_space<vmem>>, vector<16x124xf32>,
    %c0_172 = arith.constant 0 : index
    %c24 = arith.constant 24 : index
    %135 = vector.load %arg11[%c0_172, %c24] : memref<16x184xf32, #tpu.memory_space<vmem>>, vector<16x124xf32>
    %c48_173 = arith.constant 48 : index
    %c0_174 = arith.constant 0 : index
    %136 = vector.load %arg12[%c48_173, %c0_174] : memref<128x124xf32, #tpu.memory_space<vmem>>, vector<16x124xf32>
    tpu.vector_store %arg12[%c48_173, %c0_174], %135 {strides = array<i32>} : memref<128x124xf32, #tpu.memory_space<vmem>>, vector<16x124xf32>,
    %c0_175 = arith.constant 0 : index
    %c32_176 = arith.constant 32 : index
    %137 = vector.load %arg11[%c0_175, %c32_176] : memref<16x184xf32, #tpu.memory_space<vmem>>, vector<16x124xf32>
    %c64_177 = arith.constant 64 : index
    %c0_178 = arith.constant 0 : index
    %138 = vector.load %arg12[%c64_177, %c0_178] : memref<128x124xf32, #tpu.memory_space<vmem>>, vector<16x124xf32>
    tpu.vector_store %arg12[%c64_177, %c0_178], %137 {strides = array<i32>} : memref<128x124xf32, #tpu.memory_space<vmem>>, vector<16x124xf32>,
    %c0_179 = arith.constant 0 : index
    %c40_180 = arith.constant 40 : index
    %139 = vector.load %arg11[%c0_179, %c40_180] : memref<16x184xf32, #tpu.memory_space<vmem>>, vector<16x124xf32>
    %c80_181 = arith.constant 80 : index
    %c0_182 = arith.constant 0 : index
    %140 = vector.load %arg12[%c80_181, %c0_182] : memref<128x124xf32, #tpu.memory_space<vmem>>, vector<16x124xf32>
    tpu.vector_store %arg12[%c80_181, %c0_182], %139 {strides = array<i32>} : memref<128x124xf32, #tpu.memory_space<vmem>>, vector<16x124xf32>,
    %c0_183 = arith.constant 0 : index
    %c48_184 = arith.constant 48 : index
    %141 = vector.load %arg11[%c0_183, %c48_184] : memref<16x184xf32, #tpu.memory_space<vmem>>, vector<16x124xf32>
    %c96_185 = arith.constant 96 : index
    %c0_186 = arith.constant 0 : index
    %142 = vector.load %arg12[%c96_185, %c0_186] : memref<128x124xf32, #tpu.memory_space<vmem>>, vector<16x124xf32>
    tpu.vector_store %arg12[%c96_185, %c0_186], %141 {strides = array<i32>} : memref<128x124xf32, #tpu.memory_space<vmem>>, vector<16x124xf32>,
    %c0_187 = arith.constant 0 : index
    %c56_188 = arith.constant 56 : index
    %143 = vector.load %arg11[%c0_187, %c56_188] : memref<16x184xf32, #tpu.memory_space<vmem>>, vector<16x124xf32>
    %c112_189 = arith.constant 112 : index
    %c0_190 = arith.constant 0 : index
    %144 = vector.load %arg12[%c112_189, %c0_190] : memref<128x124xf32, #tpu.memory_space<vmem>>, vector<16x124xf32>
    tpu.vector_store %arg12[%c112_189, %c0_190], %143 {strides = array<i32>} : memref<128x124xf32, #tpu.memory_space<vmem>>, vector<16x124xf32>,
    %c0_191 = arith.constant 0 : index
    %c0_192 = arith.constant 0 : index
    %145 = vector.load %arg12[%c0_191, %c0_192] : memref<128x124xf32, #tpu.memory_space<vmem>>, vector<128x124xf32>
    %c0_193 = arith.constant 0 : index
    %c0_194 = arith.constant 0 : index
    %146 = vector.load %arg8[%c0_193, %c0_194] : memref<124x1xf32, #tpu.memory_space<vmem>>, vector<124x1xf32>
    %cst_195 = arith.constant dense<0.000000e+00> : vector<128x1xf32>
    %147 = tpu.matmul %145, %146, %cst_195 {dimension_numbers = #tpu.dot_dimension_numbers<[1], [0], [0], [1], [0, 0, 1, 1], [], []>} : vector<128x124xf32>, vector<124x1xf32>, vector<128x1xf32> -> vector<128x1xf32>
    %c0_196 = arith.constant 0 : index
    %c4 = arith.constant 4 : index
    %148 = vector.load %arg11[%c0_196, %c4] : memref<16x184xf32, #tpu.memory_space<vmem>>, vector<16x124xf32>
    %c0_197 = arith.constant 0 : index
    %c0_198 = arith.constant 0 : index
    %149 = vector.load %arg12[%c0_197, %c0_198] : memref<128x124xf32, #tpu.memory_space<vmem>>, vector<16x124xf32>
    tpu.vector_store %arg12[%c0_197, %c0_198], %148 {strides = array<i32>} : memref<128x124xf32, #tpu.memory_space<vmem>>, vector<16x124xf32>,
    %c0_199 = arith.constant 0 : index
    %c12 = arith.constant 12 : index
    %150 = vector.load %arg11[%c0_199, %c12] : memref<16x184xf32, #tpu.memory_space<vmem>>, vector<16x124xf32>
    %c16_200 = arith.constant 16 : index
    %c0_201 = arith.constant 0 : index
    %151 = vector.load %arg12[%c16_200, %c0_201] : memref<128x124xf32, #tpu.memory_space<vmem>>, vector<16x124xf32>
    tpu.vector_store %arg12[%c16_200, %c0_201], %150 {strides = array<i32>} : memref<128x124xf32, #tpu.memory_space<vmem>>, vector<16x124xf32>,
    %c0_202 = arith.constant 0 : index
    %c20 = arith.constant 20 : index
    %152 = vector.load %arg11[%c0_202, %c20] : memref<16x184xf32, #tpu.memory_space<vmem>>, vector<16x124xf32>
    %c32_203 = arith.constant 32 : index
    %c0_204 = arith.constant 0 : index
    %153 = vector.load %arg12[%c32_203, %c0_204] : memref<128x124xf32, #tpu.memory_space<vmem>>, vector<16x124xf32>
    tpu.vector_store %arg12[%c32_203, %c0_204], %152 {strides = array<i32>} : memref<128x124xf32, #tpu.memory_space<vmem>>, vector<16x124xf32>,
    %c0_205 = arith.constant 0 : index
    %c28 = arith.constant 28 : index
    %154 = vector.load %arg11[%c0_205, %c28] : memref<16x184xf32, #tpu.memory_space<vmem>>, vector<16x124xf32>
    %c48_206 = arith.constant 48 : index
    %c0_207 = arith.constant 0 : index
    %155 = vector.load %arg12[%c48_206, %c0_207] : memref<128x124xf32, #tpu.memory_space<vmem>>, vector<16x124xf32>
    tpu.vector_store %arg12[%c48_206, %c0_207], %154 {strides = array<i32>} : memref<128x124xf32, #tpu.memory_space<vmem>>, vector<16x124xf32>,
    %c0_208 = arith.constant 0 : index
    %c36_209 = arith.constant 36 : index
    %156 = vector.load %arg11[%c0_208, %c36_209] : memref<16x184xf32, #tpu.memory_space<vmem>>, vector<16x124xf32>
    %c64_210 = arith.constant 64 : index
    %c0_211 = arith.constant 0 : index
    %157 = vector.load %arg12[%c64_210, %c0_211] : memref<128x124xf32, #tpu.memory_space<vmem>>, vector<16x124xf32>
    tpu.vector_store %arg12[%c64_210, %c0_211], %156 {strides = array<i32>} : memref<128x124xf32, #tpu.memory_space<vmem>>, vector<16x124xf32>,
    %c0_212 = arith.constant 0 : index
    %c44_213 = arith.constant 44 : index
    %158 = vector.load %arg11[%c0_212, %c44_213] : memref<16x184xf32, #tpu.memory_space<vmem>>, vector<16x124xf32>
    %c80_214 = arith.constant 80 : index
    %c0_215 = arith.constant 0 : index
    %159 = vector.load %arg12[%c80_214, %c0_215] : memref<128x124xf32, #tpu.memory_space<vmem>>, vector<16x124xf32>
    tpu.vector_store %arg12[%c80_214, %c0_215], %158 {strides = array<i32>} : memref<128x124xf32, #tpu.memory_space<vmem>>, vector<16x124xf32>,
    %c0_216 = arith.constant 0 : index
    %c52_217 = arith.constant 52 : index
    %160 = vector.load %arg11[%c0_216, %c52_217] : memref<16x184xf32, #tpu.memory_space<vmem>>, vector<16x124xf32>
    %c96_218 = arith.constant 96 : index
    %c0_219 = arith.constant 0 : index
    %161 = vector.load %arg12[%c96_218, %c0_219] : memref<128x124xf32, #tpu.memory_space<vmem>>, vector<16x124xf32>
    tpu.vector_store %arg12[%c96_218, %c0_219], %160 {strides = array<i32>} : memref<128x124xf32, #tpu.memory_space<vmem>>, vector<16x124xf32>,
    %c0_220 = arith.constant 0 : index
    %c60_221 = arith.constant 60 : index
    %162 = vector.load %arg11[%c0_220, %c60_221] : memref<16x184xf32, #tpu.memory_space<vmem>>, vector<16x124xf32>
    %c112_222 = arith.constant 112 : index
    %c0_223 = arith.constant 0 : index
    %163 = vector.load %arg12[%c112_222, %c0_223] : memref<128x124xf32, #tpu.memory_space<vmem>>, vector<16x124xf32>
    tpu.vector_store %arg12[%c112_222, %c0_223], %162 {strides = array<i32>} : memref<128x124xf32, #tpu.memory_space<vmem>>, vector<16x124xf32>,
    %c0_224 = arith.constant 0 : index
    %c0_225 = arith.constant 0 : index
    %164 = vector.load %arg12[%c0_224, %c0_225] : memref<128x124xf32, #tpu.memory_space<vmem>>, vector<128x124xf32>
    %c0_226 = arith.constant 0 : index
    %c0_227 = arith.constant 0 : index
    %165 = vector.load %arg8[%c0_226, %c0_227] : memref<124x1xf32, #tpu.memory_space<vmem>>, vector<124x1xf32>
    %cst_228 = arith.constant dense<0.000000e+00> : vector<128x1xf32>
    %166 = tpu.matmul %164, %165, %cst_228 {dimension_numbers = #tpu.dot_dimension_numbers<[1], [0], [0], [1], [0, 0, 1, 1], [], []>} : vector<128x124xf32>, vector<124x1xf32>, vector<128x1xf32> -> vector<128x1xf32>
    %167 = arith.maximumf %147, %166 : vector<128x1xf32>
    %c0_229 = arith.constant 0 : index
    %c0_230 = arith.constant 0 : index
    %168 = vector.load %arg9[%c0_229, %c0_230] : memref<1x1xf32, #tpu.memory_space<vmem>>, vector<1x1xf32>
    %169 = vector.broadcast %168 : vector<1x1xf32> to vector<128x1xf32>
    %170 = arith.addf %167, %169 : vector<128x1xf32>
    %171 = vector.shape_cast %170 : vector<128x1xf32> to vector<8x16x1xf32>
    %c0_231 = arith.constant 0 : index
    %c0_232 = arith.constant 0 : index
    %c3 = arith.constant 3 : index
    %172 = vector.load %arg10[%c0_231, %c0_232, %c3] : memref<8x16x4xf32, #tpu.memory_space<vmem>>, vector<8x16x1xf32>
    tpu.vector_store %arg10[%c0_231, %c0_232, %c3], %171 {strides = array<i32>} : memref<8x16x4xf32, #tpu.memory_space<vmem>>, vector<8x16x1xf32>,
    return
  }
  func.func @transform_0(%arg0: i32) -> (i32, i32) {
    %c0_i32 = arith.constant 0 : i32
    %c0_i32_0 = arith.constant 0 : i32
    return %arg0, %c0_i32 : i32, i32
  }
  func.func @transform_1(%arg0: i32) -> (i32, i32) {
    %c0_i32 = arith.constant 0 : i32
    %c0_i32_0 = arith.constant 0 : i32
    %c0_i32_1 = arith.constant 0 : i32
    return %c0_i32, %c0_i32_0 : i32, i32
  }
  func.func @transform_2(%arg0: i32) -> (i32, i32) {
    %c0_i32 = arith.constant 0 : i32
    %c0_i32_0 = arith.constant 0 : i32
    %c0_i32_1 = arith.constant 0 : i32
    return %c0_i32, %c0_i32_0 : i32, i32
  }
  func.func @transform_3(%arg0: i32) -> (i32, i32) {
    %c0_i32 = arith.constant 0 : i32
    %c0_i32_0 = arith.constant 0 : i32
    %c0_i32_1 = arith.constant 0 : i32
    return %c0_i32, %c0_i32_0 : i32, i32
  }
  func.func @transform_4(%arg0: i32) -> (i32, i32) {
    %c0_i32 = arith.constant 0 : i32
    %c0_i32_0 = arith.constant 0 : i32
    %c0_i32_1 = arith.constant 0 : i32
    return %c0_i32, %c0_i32_0 : i32, i32
  }
  func.func @transform_5(%arg0: i32) -> (i32, i32) {
    %c0_i32 = arith.constant 0 : i32
    %c0_i32_0 = arith.constant 0 : i32
    %c0_i32_1 = arith.constant 0 : i32
    return %c0_i32, %c0_i32_0 : i32, i32
  }
  func.func @transform_6(%arg0: i32) -> (i32, i32) {
    %c0_i32 = arith.constant 0 : i32
    %c0_i32_0 = arith.constant 0 : i32
    %c0_i32_1 = arith.constant 0 : i32
    return %c0_i32, %c0_i32_0 : i32, i32
  }
  func.func @transform_7(%arg0: i32) -> (i32, i32) {
    %c0_i32 = arith.constant 0 : i32
    %c0_i32_0 = arith.constant 0 : i32
    %c0_i32_1 = arith.constant 0 : i32
    return %c0_i32, %c0_i32_0 : i32, i32
  }
  func.func @transform_8(%arg0: i32) -> (i32, i32) {
    %c0_i32 = arith.constant 0 : i32
    %c0_i32_0 = arith.constant 0 : i32
    %c0_i32_1 = arith.constant 0 : i32
    return %c0_i32, %c0_i32_0 : i32, i32
  }
  func.func @transform_9(%arg0: i32) -> (i32, i32, i32) {
    %c0_i32 = arith.constant 0 : i32
    %c0_i32_0 = arith.constant 0 : i32
    %c0_i32_1 = arith.constant 0 : i32
    return %c0_i32, %arg0, %c0_i32_0 : i32, i32, i32
  }
}

</mosaic_0001>

<bundles_post_ra>
// kernel: tpu_custom_call.1
= control target key start
LH: loop header
LB: loop body
LE: loop exit
PB: predicated region body
PF: predicated region fallthrough
CT: control target
= control target key end

     0   :  { %s4796_s0 = inlined_call_operand.vmem [shape: bf16[32,64], index: 0, kind: input, shape index: {}]   ;;  %s4797_s1 = inlined_call_operand.vmem [shape: f32[3,64], index: 1, kind: input, shape index: {}]   ;;  %s4798_s2 = inlined_call_operand.vmem [shape: f32[3,64], index: 2, kind: input, shape index: {}]   ;;  %s4799_s3 = inlined_call_operand.vmem [shape: f32[12,2], index: 3, kind: input, shape index: {}]   ;;  %s4800_s4 = inlined_call_operand.vmem [shape: f32[1,2], index: 4, kind: input, shape index: {}]   ;;  %s4801_s5 = inlined_call_operand.vmem [shape: f32[60,1], index: 5, kind: input, shape index: {}]   ;;  %s4802_s6 = inlined_call_operand.<no memory space> [shape: f32[1,1], index: 6, kind: input, shape index: {}]   ;;  %s4803_s7 = inlined_call_operand.vmem [shape: f32[124,1], index: 7, kind: input, shape index: {}]   ;;  %s4804_s9 = inlined_call_operand.vmem [shape: f32[8,32,4], index: 9, kind: output, shape index: {}]   ;;  %s4805_s8 = inlined_call_operand.<no memory space> [shape: f32[1,1], index: 8, kind: input, shape index: {}]  }
   0x1   :  { %v14_v0 = vstv %s4802_s6  ;;  %v16_v1 = vstv %s4805_s8 }
   0x2   :  { %15 = vst [vmem:[#allocation4] sm:$0x1] %v14_v0  ;;  %17 = vst [vmem:[#allocation5] sm:$0x1] %v16_v1 }
   0x3   :  { %s3811_s13 = smov 0   ;;  %s3813_s14 = smov 0  }
   0x4   :  { %s3815_s15 = smov 0  }
   0x5 LB: > { %s3824_s6 = sadd.s32 4294967295, %s3720_s15   ;;  %s3826_s8 = sadd.s32 1, %s3720_s15   ;;  %s3720_s15 = sphi %s3815_s15, %s4814_s15   ;;  %s3716_s14 = sphi %s3813_s14, %s4813_s14   ;;  %s3712_s13 = sphi %s3811_s13, %s4812_s13  }
   0x6   : > { %s221_s16 = ssub.s32 %s3720_s15, %s3826_s8  ;;  %s224_s17 = sadd.s32 1, %s3716_s14 }
   0x7   : > { %p222_p0 = scmp.eq.s32.totalorder %s221_s16, 0  ;;  %p234_p1 = scmp.ne.s32.totalorder %s3716_s14, %s3712_s13 }
   0x8   : > { %p235_p2 = scmp.eq.s32.totalorder %s3824_s6, 1  ;;  %p3004_p3 = scmp.ge.s32.totalorder %s3720_s15, 1 }
   0x9   : > { %s3834_s18 = scalar_select %p222_p0, %s3716_s14, %s224_s17  }
   0xa   : > { %p3836_p4 = por %p235_p2, %p234_p1  ;;  %p292_p5 = scmp.lt.s32.totalorder %s3720_s15, 3 }
   0xc   : > { %p293_p6 = pnand %p3004_p3, %p292_p5 }
   0xd   : > { %s3006_s20 = sshll.u32 (!%p293_p6), %s3824_s6, 1  ;;  %vm343_vm0 = vcmask (!%p293_p6), 457728   ;;  %v3722_v2 = vmov (!%p293_p6), 0.0   ;;  %vm338_vm1 = vcmask (!%p293_p6), 490496   ;;  %vm341_vm2 = vcmask (!%p293_p6), 1048544   ;;  %s3723_s16 = smov (!%p293_p6), 56  }
   0xe   : > { %296 = sbr.rel (%p293_p6) target bundleno = 887 (0x377), region = 56  ;;  %p328_p7 = scmp.lt.s32.totalorder (!%p293_p6), %s3006_s20, 3  ;;  %344 = vst.msk [vmem:[#allocation2 + $0x8] sm:$0xff] (!%p293_p6), %vm343_vm0, %v3722_v2  ;;  %346 = vst.msk [vmem:[#allocation2 + $0x18] sm:$0xff] (!%p293_p6), %vm343_vm0, %v3722_v2  ;;  %v3008_v4 = vld [vmem:[%s4797_s1] ss:$0 sm:$0xff] (!%p293_p6) }
   0xf   : > { %339 = vst.msk [vmem:[#allocation2] sm:$0xff] (!%p293_p6), %vm338_vm1, %v3722_v2  ;;  %340 = vst.msk [vmem:[#allocation2 + $0x10] sm:$0xff] (!%p293_p6), %vm338_vm1, %v3722_v2  ;;  %v3045_v5 = vld [vmem:[%s4797_s1 + $0x1] ss:$0 sm:$0xff] (!%p293_p6)  ;;  %v3082_v8 = vld [vmem:[%s4797_s1 + $0x2] ss:$0 sm:$0xff] (!%p293_p6) }
  0x10   : > { %342 = vst.msk [vmem:[#allocation2] sm:$0xff] (!%p293_p6), %vm341_vm2, %v3722_v2  ;;  %345 = vst.msk [vmem:[#allocation2 + $0x10] sm:$0xff] (!%p293_p6), %vm341_vm2, %v3722_v2  ;;  %v3009_v9 = vld [vmem:[%s4798_s2] ss:$0 sm:$0xff] (!%p293_p6)  ;;  %v3046_v11 = vld [vmem:[%s4798_s2 + $0x1] ss:$0 sm:$0xff] (!%p293_p6) }
  0x11   : > { %v3083_v16 = vld [vmem:[%s4798_s2 + $0x2] ss:$0 sm:$0xff] (!%p293_p6)  ;;  %s3725_s22 = smov (!%p293_p6), 48   ;;  %s3726_s23 = smov (!%p293_p6), 40   ;;  %vm375_vm9 = vcmask (!%p293_p6), 1015264   ;;  %vm541_vm10 = vcmask (!%p293_p6), 1043456  }
  0x12   : > { %s3728_s25 = smov (!%p293_p6), 44   ;;  %v491_v41 = vld [vmem:[%s4799_s3] sm:$0xff] (!%p293_p6)  ;;  %v492_v42 = vld [vmem:[%s4799_s3 + $0x8] sm:$0xf] (!%p293_p6)  ;;  %vm3729_vm11 = vmmov (!%p293_p6), 1   ;;  %s3730_s30 = smov (!%p293_p6), 72  }
  0x13   : > { %v3525_v43 = vpack.c.bf16 (!%p293_p6), %v492_v42, %v491_v41  ;;  %vm3905_vm12 = vmpackc.low (!%p293_p6), %vm541_vm10, %vm3729_vm11  ;;  %s3731_s10 = smov (!%p293_p6), 64   ;;  %v803_v51 = vld [vmem:[%s4799_s3 + $0x8] sm:$0xf] (!%p293_p6)  ;;  %s4806_s15 = smov (!%p293_p6), 68   ;;  %v1230_v56 = vld [vmem:[%s4801_s5] sm:$0xff] (!%p293_p6)  ;;  %vm388_vm13 = vcmask (!%p293_p6), 97280  }
  0x14   : > { %v3531_v52 = vpack.c.bf16 (!%p293_p6), %v803_v51, %v491_v41  ;;  %s3733_s17 = smov (!%p293_p6), 32   ;;  %s3735_s26 = smov (!%p293_p6), 36   ;;  %v1231_v57 = vld [vmem:[%s4801_s5 + $0x8] sm:$0xff] (!%p293_p6)  ;;  %vm1935_vm14 = vcmask (!%p293_p6), 1014784   ;;  %vm1184_vm15 = vcmask (!%p293_p6), 392192   ;;  %vm1510_vm2 = vcmask (!%p293_p6), 424960  }
  0x15   : > { %s4816_s20 = smov (!%p328_p7, %s3006_s20), 3  ;;  %v3860_v10 = vld [vmem:[#allocation2 + $0x8] sm:$0xff]  ;;  %v3870_v17 = vld [vmem:[#allocation2 + $0x18] sm:$0xff]  ;;  %3527 = vmatprep.subr.msk.bf16.mxu0 %vm3905_vm12, %v3525_v43  ;;  %v3954_v58 = vpack.c.bf16 %v1231_v57, %v1230_v56  ;;  %s3736_s12 = smov 16   ;;  %vm2046_vm10 = vcmask 719872   ;;  %vm2401_vm11 = vcmask 818176  }
  0x16   : > { %s3007_s21 = sshll.u32 %s4816_s20, 2  ;;  %1156 = vrot.lane.b32.xlu1 %v3860_v10, %s3723_s16  ;;  %3530 = vmatpush3.bf16.msk.msra.mxu0 %vm3905_vm12, %v3525_v43  ;;  %s3734_s20 = smov 24  }
  0x17   : > { %s331_s24 = scalar_lea.vmem %s4796_s0, %s3007_s21  ;;  %s3724_s21 = smov 60   ;;  %3533 = vmatprep.subr.msk.bf16.mxu1 %vm3905_vm12, %v3531_v52  ;;  %3538 = vmatprep.subr.bf16.mxu0 %v3954_v58 }
  0x18   : > { %v3126_v3 = vld [vmem:[%s331_s24] sm:$0xff]   ;;  %s3727_s24 = smov 52   ;;  %3536 = vmatpush3.bf16.msk.msra.mxu1 %vm3905_vm12, %v3531_v52  ;;  %s3739_s27 = smov 96  }
  0x19   : > { %v3127_v6 = vunpack.c.l.bf16 %v3126_v3  ;;  %v3128_v7 = vunpack.c.h.bf16 %v3126_v3  ;;  %3556 = vmatprep.subr.bf16.mxu1 %v3954_v58  ;;  %s3740_s28 = smov 12   ;;  %s3741_s29 = smov 88  }
  0x1a   : > { %1160 = vrot.lane.b32.xlu1 %v3870_v17, %s3723_s16  ;;  %s3742_s11 = smov 80  }
  0x1b   : > { %v352_v12 = vmul.f32 %v3127_v6, %v3008_v4  ;;  %v353_v13 = vmul.f32 %v3128_v7, %v3008_v4  ;;  %v1061_v14 = vmul.f32 %v3127_v6, %v3045_v5  ;;  %v1062_v15 = vmul.f32 %v3128_v7, %v3045_v5 }
  0x1c   : > { %v1909_v18 = vmul.f32 %v3128_v7, %v3082_v8  ;;  %v1908_v19 = vmul.f32 %v3127_v6, %v3082_v8  ;;  %v1232_v8 = vld [vmem:[%s4801_s5 + $0x10] sm:$0xff] }
  0x1d   : > { %v359_v20 = vadd.f32 %v3009_v9, %v352_v12  ;;  %v360_v21 = vadd.f32 %v3009_v9, %v353_v13  ;;  %v1068_v22 = vadd.f32 %v3046_v11, %v1061_v14  ;;  %v1069_v23 = vadd.f32 %v3046_v11, %v1062_v15  ;;  %v1233_v9 = vld [vmem:[%s4801_s5 + $0x18] sm:$0xff] }
  0x1e   : > { %v1916_v24 = vadd.f32 %v3083_v16, %v1909_v18  ;;  %v1915_v27 = vadd.f32 %v3083_v16, %v1908_v19  ;;  %v4047_v15 = vpack.c.bf16 %v1233_v9, %v1232_v8  ;;  %v1234_v16 = vld [vmem:[%s4801_s5 + $0x20] sm:$0xff]  ;;  %v1235_v18 = vld [vmem:[%s4801_s5 + $0x28] sm:$0xff] }
  0x1f   : > { %vm361_vm3 = vcmp.ge.f32.partialorder %v359_v20, 0.0  ;;  %v363_v25 = vmul.f32 0.01, %v359_v20  ;;  %v364_v26 = vmul.f32 0.01, %v360_v21  ;;  %vm362_vm4 = vcmp.ge.f32.partialorder %v360_v21, 0.0 }
  0x20   : > { %vm1070_vm5 = vcmp.ge.f32.partialorder %v1068_v22, 0.0  ;;  %v1072_v28 = vmul.f32 0.01, %v1068_v22  ;;  %v1073_v29 = vmul.f32 0.01, %v1069_v23  ;;  %vm1071_vm6 = vcmp.ge.f32.partialorder %v1069_v23, 0.0 }
  0x21   : > { %v365_v30 = vsel %vm361_vm3, %v359_v20, %v363_v25  ;;  %v366_v32 = vsel %vm362_vm4, %v360_v21, %v364_v26  ;;  %v1919_v33 = vmul.f32 0.01, %v1915_v27  ;;  %v1920_v35 = vmul.f32 0.01, %v1916_v24  ;;  %v1237_v25 = vld [vmem:[%s4801_s5 + $0x38] sm:$0xf] }
  0x22   : > { %369 = vrot.lane.b32.xlu0 %v365_v30, %s3724_s21  ;;  %v1074_v31 = vsel %vm1070_vm5, %v1068_v22, %v1072_v28  ;;  %v1075_v34 = vsel %vm1071_vm6, %v1069_v23, %v1073_v29  ;;  %vm1917_vm7 = vcmp.ge.f32.partialorder %v1915_v27, 0.0  ;;  %vm1918_vm8 = vcmp.ge.f32.partialorder %v1916_v24, 0.0 }
  0x23   : > { %1078 = vrot.lane.b32.xlu1 %v1074_v31, %s3724_s21  ;;  %v1921_v36 = vsel %vm1917_vm7, %v1915_v27, %v1919_v33  ;;  %v1922_v37 = vsel %vm1918_vm8, %v1916_v24, %v1920_v35  ;;  %v4065_v23 = vpack.c.bf16 %v1235_v18, %v1234_v16  ;;  %v1236_v24 = vld [vmem:[%s4801_s5 + $0x30] sm:$0xff]  ;;  %v2116_v33 = vld [vmem:[%s4803_s7 + $0x8] sm:$0xff]  ;;  %vm1533_vm3 = vcmask 359424  }
  0x24   : > { %v3549_v30 = vpack.c.bf16 %v1237_v25, %v1236_v24  ;;  %v4186_v16 = vld [vmem:[#allocation2 + $0x8] sm:$0xff]  ;;  %vm1556_vm4 = vcmask 293888   ;;  %vm1954_vm5 = vcmask 982016   ;;  %vm1977_vm6 = vcmask 916480  }
  0x25   : > { %vm2000_vm7 = vcmask 850944   ;;  %vm2023_vm8 = vcmask 785408  }
  0x26   : > { %371 = vrot.lane.b32.xlu0 %v366_v32, %s3724_s21  ;;  %v2115_v32 = vld [vmem:[%s4803_s7] sm:$0xff] }
  0x27   : > { %1080 = vrot.lane.b32.xlu1 %v1075_v34, %s3724_s21 }
  0x2a   : > { %1925 = vrot.lane.b32.xlu0 %v1921_v36, %s3724_s21 }
  0x2b   : > { %1927 = vrot.lane.b32.xlu1 %v1922_v37, %s3724_s21 }
  0x2f   : > { %1178 = vrot.lane.b32.xlu1 %v3860_v10, %s3725_s22 }
  0x33   : > { %1182 = vrot.lane.b32.xlu1 %v3870_v17, %s3725_s22 }
  0x37   : > { %1201 = vrot.lane.b32.xlu1 %v3860_v10, %s3726_s23 }
  0x3b   : > { %1504 = vrot.lane.b32.xlu1 %v3860_v10, %s3727_s24 }
  0x3f   : > { %1205 = vrot.lane.b32.xlu1 %v3870_v17, %s3726_s23 }
  0x43   : > { %1508 = vrot.lane.b32.xlu1 %v3870_v17, %s3727_s24 }
  0x47   : > { %1527 = vrot.lane.b32.xlu1 %v3860_v10, %s3728_s25 }
  0x88   : > { %v3894_v38 = vpop.permute.xlu1 %1156 }
  0x8c   : > { %v3896_v39 = vpop.permute.xlu1 %1160 }
  0x94   : > { %v370_v40 = vpop.permute.xlu0 %369 }
  0x95   : > { %376 = vst.msk [vmem:[#allocation2] sm:$0xff] %vm375_vm9, %v370_v40  ;;  %v1079_v46 = vpop.permute.xlu1 %1078  ;;  %v4102_v40 = vpack.c.bf16 %v2116_v33, %v2115_v32 }
  0x98   : > { %v372_v45 = vpop.permute.xlu0 %371 }
  0x99   : > { %377 = vst.msk [vmem:[#allocation2 + $0x10] sm:$0xff] %vm375_vm9, %v372_v45  ;;  %v1081_v48 = vpop.permute.xlu1 %1080 }
  0x9c   : > { %v774_v47 = vld [vmem:[#allocation2] sm:$0xff]  ;;  %v1926_v50 = vpop.permute.xlu0 %1925 }
  0x9d   : > { %382 = vrot.lane.b32.xlu0 %v774_v47, %s3730_s30  ;;  %1084 = vst.msk [vmem:[#allocation2] sm:$0xff] %vm375_vm9, %v1079_v46  ;;  %v1928_v55 = vpop.permute.xlu1 %1927  ;;  %v1586_v46 = vld [vmem:[%s4801_s5 + $0x38] sm:$0xf] }
  0x9e   : > { %v3567_v51 = vpack.c.bf16 %v1586_v46, %v1236_v24 }
  0xa0   : > { %v775_v49 = vld [vmem:[#allocation2 + $0x10] sm:$0xff] }
  0xa1   : > { %395 = vrot.lane.b32.xlu0 %v774_v47, %s3731_s10  ;;  %384 = vrot.lane.b32.xlu1 %v775_v49, %s3730_s30  ;;  %1085 = vst.msk [vmem:[#allocation2 + $0x10] sm:$0xff] %vm375_vm9, %v1081_v48  ;;  %v3973_v59 = vpop.permute.xlu1 %1178 }
  0xa4   : > { %v3922_v53 = vld [vmem:[#allocation2] sm:$0xff] }
  0xa5   : > { %407 = vrot.lane.b32.xlu0 %v774_v47, %s3723_s16  ;;  %397 = vrot.lane.b32.xlu1 %v775_v49, %s3731_s10  ;;  %1931 = vst.msk [vmem:[#allocation2] sm:$0xff] %vm375_vm9, %v1926_v50  ;;  %v3979_v60 = vpop.permute.xlu1 %1182 }
  0xa8   : > { %v3931_v54 = vld [vmem:[#allocation2 + $0x10] sm:$0xff] }
  0xa9   : > { %409 = vrot.lane.b32.xlu0 %v775_v49, %s3723_s16  ;;  %694 = vrot.lane.b32.xlu1 %v774_v47, %s4806_s15  ;;  %1932 = vst.msk [vmem:[#allocation2 + $0x10] sm:$0xff] %vm375_vm9, %v1928_v55  ;;  %v3989_v61 = vpop.permute.xlu1 %1201  ;;  %vm2378_vm9 = vcmask 883712  }
  0xac   : > { %v4134_v52 = vld [vmem:[#allocation2] sm:$0xff] }
  0xad   : > { %419 = vrot.lane.b32.xlu0 %v774_v47, %s3725_s22  ;;  %696 = vrot.lane.b32.xlu1 %v775_v49, %s4806_s15  ;;  %v3995_v62 = vpop.permute.xlu1 %1504 }
  0xb0   : > { %v4087_v31 = vld [vmem:[#allocation2 + $0x10] sm:$0xff] }
  0xb1   : > { %421 = vrot.lane.b32.xlu0 %v775_v49, %s3725_s22  ;;  %706 = vrot.lane.b32.xlu1 %v774_v47, %s3724_s21  ;;  %v4005_v63 = vpop.permute.xlu1 %1205 }
  0xb5   : > { %431 = vrot.lane.b32.xlu0 %v774_v47, %s3726_s23  ;;  %708 = vrot.lane.b32.xlu1 %v775_v49, %s3724_s21  ;;  %v4011_v0 = vpop.permute.xlu1 %1508 }
  0xb9   : > { %433 = vrot.lane.b32.xlu0 %v775_v49, %s3726_s23  ;;  %718 = vrot.lane.b32.xlu1 %v774_v47, %s3727_s24  ;;  %v4021_v1 = vpop.permute.xlu1 %1527 }
  0xbd   : > { %443 = vrot.lane.b32.xlu0 %v774_v47, %s3733_s17  ;;  %720 = vrot.lane.b32.xlu1 %v775_v49, %s3727_s24 }
  0xc1   : > { %445 = vrot.lane.b32.xlu0 %v775_v49, %s3733_s17  ;;  %730 = vrot.lane.b32.xlu1 %v774_v47, %s3728_s25  ;;  %s3737_s17 = smov 28  }
  0xc5   : > { %455 = vrot.lane.b32.xlu0 %v774_v47, %s3734_s20  ;;  %732 = vrot.lane.b32.xlu1 %v775_v49, %s3728_s25 }
  0xc9   : > { %457 = vrot.lane.b32.xlu0 %v775_v49, %s3734_s20  ;;  %742 = vrot.lane.b32.xlu1 %v774_v47, %s3735_s26  ;;  %s3738_s20 = smov 20  }
  0xcd   : > { %467 = vrot.lane.b32.xlu0 %v774_v47, %s3736_s12  ;;  %744 = vrot.lane.b32.xlu1 %v775_v49, %s3735_s26 }
  0xd1   : > { %469 = vrot.lane.b32.xlu0 %v775_v49, %s3736_s12  ;;  %754 = vrot.lane.b32.xlu1 %v774_v47, %s3737_s17  ;;  %s3743_s12 = smov 92  }
  0xd5   : > { %766 = vrot.lane.b32.xlu0 %v774_v47, %s3738_s20  ;;  %756 = vrot.lane.b32.xlu1 %v775_v49, %s3737_s17  ;;  %s3744_s17 = smov 84  }
  0xd9   : > { %768 = vrot.lane.b32.xlu0 %v775_v49, %s3738_s20  ;;  %1090 = vrot.lane.b32.xlu1 %v3922_v53, %s3739_s27  ;;  %s3745_s20 = smov 76  }
  0xdd   : > { %778 = vrot.lane.b32.xlu0 %v774_v47, %s3740_s28  ;;  %1092 = vrot.lane.b32.xlu1 %v3931_v54, %s3739_s27 }
  0xe1   : > { %780 = vrot.lane.b32.xlu0 %v775_v49, %s3740_s28  ;;  %1102 = vrot.lane.b32.xlu1 %v3922_v53, %s3741_s29  ;;  %s3750_s28 = smov 116  }
  0xe5   : > { %1114 = vrot.lane.b32.xlu0 %v3922_v53, %s3742_s11  ;;  %1104 = vrot.lane.b32.xlu1 %v3931_v54, %s3741_s29 }
  0xe9   : > { %1116 = vrot.lane.b32.xlu0 %v3931_v54, %s3742_s11  ;;  %1438 = vrot.lane.b32.xlu1 %v3922_v53, %s3743_s12 }
  0xed   : > { %1126 = vrot.lane.b32.xlu0 %v3922_v53, %s3730_s30  ;;  %1440 = vrot.lane.b32.xlu1 %v3931_v54, %s3743_s12 }
  0xf1   : > { %1128 = vrot.lane.b32.xlu0 %v3931_v54, %s3730_s30  ;;  %1450 = vrot.lane.b32.xlu1 %v3922_v53, %s3744_s17 }
  0xf5   : > { %1138 = vrot.lane.b32.xlu0 %v3922_v53, %s3731_s10  ;;  %1452 = vrot.lane.b32.xlu1 %v3931_v54, %s3744_s17 }
  0xf9   : > { %1140 = vrot.lane.b32.xlu0 %v3931_v54, %s3731_s10  ;;  %1462 = vrot.lane.b32.xlu1 %v3922_v53, %s3745_s20  ;;  %s3749_s10 = smov 104  }
  0xfd   : > { %1154 = vrot.lane.b32.xlu0 %v3922_v53, %s3723_s16  ;;  %1464 = vrot.lane.b32.xlu1 %v3931_v54, %s3745_s20 }
 0x101   : > { %1158 = vrot.lane.b32.xlu0 %v3931_v54, %s3723_s16  ;;  %1476 = vrot.lane.b32.xlu1 %v3931_v54, %s4806_s15  ;;  %s3746_s16 = smov 120  }
 0x105   : > { %1474 = vrot.lane.b32.xlu0 %v3922_v53, %s4806_s15  ;;  %1488 = vrot.lane.b32.xlu1 %v3931_v54, %s3724_s21  ;;  %s3747_s15 = smov 112  }
 0x109   : > { %1176 = vrot.lane.b32.xlu0 %v3922_v53, %s3725_s22  ;;  %1531 = vrot.lane.b32.xlu1 %v3870_v17, %s3728_s25 }
 0x10d   : > { %1180 = vrot.lane.b32.xlu0 %v3931_v54, %s3725_s22  ;;  %1550 = vrot.lane.b32.xlu1 %v3860_v10, %s3735_s26  ;;  %s3748_s22 = smov 124  }
 0x10f   : > { %v383_v2 = vpop.permute.xlu0 %382 }
 0x110   : > { %389 = vst.msk [vmem:[#allocation3] sm:$0xff] %vm388_vm13, %v383_v2 }
 0x111   : > { %1486 = vrot.lane.b32.xlu0 %v3922_v53, %s3724_s21  ;;  %1948 = vrot.lane.b32.xlu1 %v3860_v10, %s3746_s16  ;;  %s3754_s21 = smov 3  }
 0x113   : > { %v385_v3 = vpop.permute.xlu1 %384  ;;  %v396_v4 = vpop.permute.xlu0 %395 }
 0x114   : > { %390 = vst.msk [vmem:[#allocation3 + $0x8] sm:$0xff] %vm388_vm13, %v385_v3  ;;  %401 = vst.msk [vmem:[#allocation3 + $0x10] sm:$0xff] %vm388_vm13, %v396_v4 }
 0x115   : > { %1199 = vrot.lane.b32.xlu0 %v3922_v53, %s3726_s23  ;;  %1554 = vrot.lane.b32.xlu1 %v3870_v17, %s3735_s26 }
 0x117   : > { %v398_v5 = vpop.permute.xlu1 %397  ;;  %v408_v6 = vpop.permute.xlu0 %407  ;;  %v475_v7 = vld [vmem:[#allocation3] sm:$0xff] }
 0x118   : > { %402 = vst.msk [vmem:[#allocation3 + $0x18] sm:$0xff] %vm388_vm13, %v398_v5  ;;  %413 = vst.msk [vmem:[#allocation3 + $0x20] sm:$0xff] %vm388_vm13, %v408_v6  ;;  %3281 = vmatprep.mubr.msk.f32.mxu0 %vm388_vm13, %v475_v7 }
 0x119   : > { %1502 = vrot.lane.b32.xlu0 %v3922_v53, %s3727_s24  ;;  %1952 = vrot.lane.b32.xlu1 %v3870_v17, %s3746_s16 }
 0x11b   : > { %v695_v11 = vpop.permute.xlu1 %694  ;;  %v410_v12 = vpop.permute.xlu0 %409  ;;  %v476_v13 = vld [vmem:[#allocation3 + $0x8] sm:$0xff]  ;;  %v477_v14 = vld [vmem:[#allocation3 + $0x10] sm:$0xff] }
 0x11c   : > { %700 = vst.msk [vmem:[#allocation3] sm:$0xff] %vm388_vm13, %v695_v11  ;;  %414 = vst.msk [vmem:[#allocation3 + $0x28] sm:$0xff] %vm388_vm13, %v410_v12  ;;  %3282 = vmatmul.mubr.msk.f32.vlgmr.msra.gmra.mrb[0].mxu0 %vm388_vm13, %v476_v13 }
 0x11d   : > { %1203 = vrot.lane.b32.xlu0 %v3931_v54, %s3726_s23  ;;  %1971 = vrot.lane.b32.xlu1 %v3860_v10, %s3747_s15  ;;  %s4811_s23 = smov 68  }
 0x11e   : > { %3284 = vmatprep.mubr.msk.f32.mxu0 %vm388_vm13, %v477_v14  ;;  %3540 = vmatpush3.bf16.msra.mxu0 %v3954_v58 }
 0x11f   : > { %v697_v19 = vpop.permute.xlu1 %696  ;;  %v420_v20 = vpop.permute.xlu0 %419  ;;  %v478_v21 = vld [vmem:[#allocation3 + $0x18] sm:$0xff]  ;;  %v479_v22 = vld [vmem:[#allocation3 + $0x20] sm:$0xff]  ;;  %3542 = vmatprep.subr.bf16.mxu0 %v4047_v15 }
 0x120   : > { %701 = vst.msk [vmem:[#allocation3 + $0x8] sm:$0xff] %vm388_vm13, %v697_v19  ;;  %425 = vst.msk [vmem:[#allocation3 + $0x30] sm:$0xff] %vm388_vm13, %v420_v20  ;;  %3285 = vmatmul.mubr.msk.f32.gmra.mrb[2].mxu0 %vm388_vm13, %v478_v21 }
 0x121   : > { %1506 = vrot.lane.b32.xlu0 %v3931_v54, %s3727_s24  ;;  %1975 = vrot.lane.b32.xlu1 %v3870_v17, %s3747_s15 }
 0x122   : > { %3287 = vmatprep.mubr.msk.f32.mxu0 %vm388_vm13, %v479_v22  ;;  %3544 = vmatpush3.bf16.msra.mxu0 %v4047_v15 }
 0x123   : > { %v707_v26 = vpop.permute.xlu1 %706  ;;  %v422_v27 = vpop.permute.xlu0 %421  ;;  %v480_v28 = vld [vmem:[#allocation3 + $0x28] sm:$0xff]  ;;  %v786_v29 = vld [vmem:[#allocation3] sm:$0xff]  ;;  %3546 = vmatprep.subr.bf16.mxu0 %v4065_v23 }
 0x124   : > { %712 = vst.msk [vmem:[#allocation3 + $0x10] sm:$0xff] %vm388_vm13, %v707_v26  ;;  %426 = vst.msk [vmem:[#allocation3 + $0x38] sm:$0xff] %vm388_vm13, %v422_v27  ;;  %3288 = vmatmul.mubr.msk.f32.gmra.mrb[4].mxu0 %vm388_vm13, %v480_v28  ;;  %3309 = vmatprep.mubr.msk.f32.mxu1 %vm388_vm13, %v786_v29  ;;  %v4204_v29 = vld [vmem:[#allocation2 + $0x18] sm:$0xff] }
 0x125   : > { %1525 = vrot.lane.b32.xlu0 %v3922_v53, %s3728_s25  ;;  %2333 = vrot.lane.b32.xlu1 %v4087_v31, %s3748_s22 }
 0x126   : > { %3548 = vmatpush3.bf16.msra.mxu0 %v4065_v23 }
 0x127   : > { %v709_v34 = vpop.permute.xlu1 %708  ;;  %v432_v35 = vpop.permute.xlu0 %431  ;;  %v481_v36 = vld [vmem:[#allocation3 + $0x30] sm:$0xff]  ;;  %v787_v37 = vld [vmem:[#allocation3 + $0x8] sm:$0xff]  ;;  %3551 = vmatprep.subr.msk.bf16.mxu0 %vm3905_vm12, %v3549_v30 }
 0x128   : > { %713 = vst.msk [vmem:[#allocation3 + $0x18] sm:$0xff] %vm388_vm13, %v709_v34  ;;  %437 = vst.msk [vmem:[#allocation3 + $0x40] sm:$0xff] %vm388_vm13, %v432_v35  ;;  %3290 = vmatprep.mubr.msk.f32.mxu0 %vm388_vm13, %v481_v36  ;;  %3310 = vmatmul.mubr.msk.f32.vlgmr.msra.gmra.mrb[0].mxu1 %vm388_vm13, %v787_v37  ;;  %v2118_v36 = vld [vmem:[%s4803_s7 + $0x18] sm:$0xff] }
 0x129   : > { %1529 = vrot.lane.b32.xlu0 %v3931_v54, %s3728_s25  ;;  %1994 = vrot.lane.b32.xlu1 %v3860_v10, %s3749_s10 }
 0x12a   : > { %3554 = vmatpush3.bf16.msk.msra.mxu0 %vm3905_vm12, %v3549_v30  ;;  %3558 = vmatpush3.bf16.msra.mxu1 %v3954_v58  ;;  %v2117_v30 = vld [vmem:[%s4803_s7 + $0x10] sm:$0xff] }
 0x12b   : > { %v719_v41 = vpop.permute.xlu1 %718  ;;  %v434_v42 = vpop.permute.xlu0 %433  ;;  %v482_v43 = vld [vmem:[#allocation3 + $0x38] sm:$0xff]  ;;  %v788_v45 = vld [vmem:[#allocation3 + $0x10] sm:$0xff]  ;;  %3560 = vmatprep.subr.bf16.mxu1 %v4047_v15  ;;  %3574 = vmatprep.subr.bf16.mxu0 %v4102_v40  ;;  %v4228_v37 = vpack.c.bf16 %v2118_v36, %v2117_v30 }
 0x12c   : > { %724 = vst.msk [vmem:[#allocation3 + $0x20] sm:$0xff] %vm388_vm13, %v719_v41  ;;  %438 = vst.msk [vmem:[#allocation3 + $0x48] sm:$0xff] %vm388_vm13, %v434_v42  ;;  %3291 = vmatmul.mubr.msk.f32.gmra.mrb[6].mxu0 %vm388_vm13, %v482_v43  ;;  %3312 = vmatprep.mubr.msk.f32.mxu1 %vm388_vm13, %v788_v45  ;;  %v2119_v41 = vld [vmem:[%s4803_s7 + $0x20] sm:$0xff] }
 0x12d   : > { %1548 = vrot.lane.b32.xlu0 %v3922_v53, %s3735_s26  ;;  %2349 = vrot.lane.b32.xlu1 %v3860_v10, %s3750_s28 }
 0x12e   : > { %3562 = vmatpush3.bf16.msra.mxu1 %v4047_v15 }
 0x12f   : > { %v721_v47 = vpop.permute.xlu1 %720  ;;  %v444_v48 = vpop.permute.xlu0 %443  ;;  %v483_v49 = vld [vmem:[#allocation3 + $0x40] sm:$0xff]  ;;  %v789_v50 = vld [vmem:[#allocation3 + $0x18] sm:$0xff]  ;;  %3564 = vmatprep.subr.bf16.mxu1 %v4065_v23 }
 0x130   : > { %725 = vst.msk [vmem:[#allocation3 + $0x28] sm:$0xff] %vm388_vm13, %v721_v47  ;;  %449 = vst.msk [vmem:[#allocation3 + $0x50] sm:$0xff] %vm388_vm13, %v444_v48  ;;  %3293 = vmatprep.mubr.msk.f32.mxu0 %vm388_vm13, %v483_v49  ;;  %3313 = vmatmul.mubr.msk.f32.gmra.mrb[2].mxu1 %vm388_vm13, %v789_v50  ;;  %v2120_v47 = vld [vmem:[%s4803_s7 + $0x28] sm:$0xff] }
 0x131   : > { %1946 = vrot.lane.b32.xlu0 %v4134_v52, %s3746_s16  ;;  %1998 = vrot.lane.b32.xlu1 %v3870_v17, %s3749_s10  ;;  %v4246_v48 = vpack.c.bf16 %v2120_v47, %v2119_v41 }
 0x132   : > { %3566 = vmatpush3.bf16.msra.mxu1 %v4065_v23 }
 0x133   : > { %v731_v53 = vpop.permute.xlu1 %730  ;;  %v446_v55 = vpop.permute.xlu0 %445  ;;  %v484_v56 = vld [vmem:[#allocation3 + $0x48] sm:$0xff]  ;;  %v790_v57 = vld [vmem:[#allocation3 + $0x20] sm:$0xff]  ;;  %3569 = vmatprep.subr.msk.bf16.mxu1 %vm3905_vm12, %v3567_v51 }
 0x134   : > { %736 = vst.msk [vmem:[#allocation3 + $0x30] sm:$0xff] %vm388_vm13, %v731_v53  ;;  %450 = vst.msk [vmem:[#allocation3 + $0x58] sm:$0xff] %vm388_vm13, %v446_v55  ;;  %3294 = vmatmul.mubr.msk.f32.gmra.mrb[8].mxu0 %vm388_vm13, %v484_v56  ;;  %3315 = vmatprep.mubr.msk.f32.mxu1 %vm388_vm13, %v790_v57  ;;  %v2121_v55 = vld [vmem:[%s4803_s7 + $0x30] sm:$0xff]  ;;  %v2122_v56 = vld [vmem:[%s4803_s7 + $0x38] sm:$0xff] }
 0x135   : > { %1552 = vrot.lane.b32.xlu0 %v3931_v54, %s3735_s26  ;;  %2353 = vrot.lane.b32.xlu1 %v3870_v17, %s3750_s28  ;;  %s3751_s26 = smov 108  }
 0x136   : > { %3572 = vmatpush3.bf16.msk.msra.mxu1 %vm3905_vm12, %v3567_v51 }
 0x137   : > { %v733_v58 = vpop.permute.xlu1 %732  ;;  %v456_v2 = vpop.permute.xlu0 %455  ;;  %v485_v3 = vld [vmem:[#allocation3 + $0x50] sm:$0xff]  ;;  %v791_v4 = vld [vmem:[#allocation3 + $0x28] sm:$0xff]  ;;  %3608 = vmatprep.subr.bf16.mxu1 %v4102_v40 }
 0x138   : > { %737 = vst.msk [vmem:[#allocation3 + $0x38] sm:$0xff] %vm388_vm13, %v733_v58  ;;  %461 = vst.msk [vmem:[#allocation3 + $0x60] sm:$0xff] %vm388_vm13, %v456_v2  ;;  %3296 = vmatprep.mubr.msk.f32.mxu0 %vm388_vm13, %v485_v3  ;;  %3316 = vmatmul.mubr.msk.f32.gmra.mrb[4].mxu1 %vm388_vm13, %v791_v4  ;;  %v4264_v4 = vpack.c.bf16 %v2122_v56, %v2121_v55 }
 0x139   : > { %1950 = vrot.lane.b32.xlu0 %v4087_v31, %s3746_s16  ;;  %2017 = vrot.lane.b32.xlu1 %v3860_v10, %s3739_s27 }
 0x13b   : > { %v743_v54 = vpop.permute.xlu1 %742  ;;  %v458_v5 = vpop.permute.xlu0 %457  ;;  %v486_v6 = vld [vmem:[#allocation3 + $0x58] sm:$0xff]  ;;  %v792_v7 = vld [vmem:[#allocation3 + $0x30] sm:$0xff] }
 0x13c   : > { %748 = vst.msk [vmem:[#allocation3 + $0x40] sm:$0xff] %vm388_vm13, %v743_v54  ;;  %462 = vst.msk [vmem:[#allocation3 + $0x68] sm:$0xff] %vm388_vm13, %v458_v5  ;;  %3297 = vmatmul.mubr.msk.f32.gmra.mrb[10].mxu0 %vm388_vm13, %v486_v6  ;;  %3318 = vmatprep.mubr.msk.f32.mxu1 %vm388_vm13, %v792_v7  ;;  %v2123_v54 = vld [vmem:[%s4803_s7 + $0x40] sm:$0xff]  ;;  %v2124_v5 = vld [vmem:[%s4803_s7 + $0x48] sm:$0xff] }
 0x13d   : > { %1969 = vrot.lane.b32.xlu0 %v4134_v52, %s3747_s15  ;;  %2372 = vrot.lane.b32.xlu1 %v3860_v10, %s3751_s26 }
 0x13f   : > { %v745_v8 = vpop.permute.xlu1 %744  ;;  %v468_v9 = vpop.permute.xlu0 %467  ;;  %v487_v11 = vld [vmem:[#allocation3 + $0x60] sm:$0xff]  ;;  %v793_v12 = vld [vmem:[#allocation3 + $0x38] sm:$0xff] }
 0x140   : > { %749 = vst.msk [vmem:[#allocation3 + $0x48] sm:$0xff] %vm388_vm13, %v745_v8  ;;  %473 = vst.msk [vmem:[#allocation3 + $0x70] sm:$0xff] %vm388_vm13, %v468_v9  ;;  %3299 = vmatprep.mubr.msk.f32.mxu0 %vm388_vm13, %v487_v11  ;;  %3319 = vmatmul.mubr.msk.f32.gmra.mrb[6].mxu1 %vm388_vm13, %v793_v12  ;;  %v4282_v11 = vpack.c.bf16 %v2124_v5, %v2123_v54  ;;  %v2125_v12 = vld [vmem:[%s4803_s7 + $0x50] sm:$0xff] }
 0x141   : > { %1973 = vrot.lane.b32.xlu0 %v4087_v31, %s3747_s15  ;;  %2021 = vrot.lane.b32.xlu1 %v3870_v17, %s3739_s27  ;;  %s3752_s15 = smov 100  }
 0x143   : > { %v755_v13 = vpop.permute.xlu1 %754  ;;  %v470_v10 = vpop.permute.xlu0 %469  ;;  %v488_v14 = vld [vmem:[#allocation3 + $0x68] sm:$0xff]  ;;  %v794_v15 = vld [vmem:[#allocation3 + $0x40] sm:$0xff] }
 0x144   : > { %760 = vst.msk [vmem:[#allocation3 + $0x50] sm:$0xff] %vm388_vm13, %v755_v13  ;;  %474 = vst.msk [vmem:[#allocation3 + $0x78] sm:$0xff] %vm388_vm13, %v470_v10  ;;  %3300 = vmatmul.mubr.msk.f32.gmra.mrb[12].mxu0 %vm388_vm13, %v488_v14  ;;  %3321 = vmatprep.mubr.msk.f32.mxu1 %vm388_vm13, %v794_v15  ;;  %v2126_v13 = vld [vmem:[%s4803_s7 + $0x58] sm:$0xff] }
 0x145   : > { %2331 = vrot.lane.b32.xlu0 %v4134_v52, %s3748_s22  ;;  %2376 = vrot.lane.b32.xlu1 %v3870_v17, %s3751_s26 }
 0x147   : > { %v757_v18 = vpop.permute.xlu1 %756  ;;  %v767_v19 = vpop.permute.xlu0 %766  ;;  %v489_v20 = vld [vmem:[#allocation3 + $0x70] sm:$0xff]  ;;  %v795_v21 = vld [vmem:[#allocation3 + $0x48] sm:$0xff] }
 0x148   : > { %761 = vst.msk [vmem:[#allocation3 + $0x58] sm:$0xff] %vm388_vm13, %v757_v18  ;;  %772 = vst.msk [vmem:[#allocation3 + $0x60] sm:$0xff] %vm388_vm13, %v767_v19  ;;  %3302 = vmatprep.mubr.msk.f32.mxu0 %vm388_vm13, %v489_v20  ;;  %3322 = vmatmul.mubr.msk.f32.gmra.mrb[8].mxu1 %vm388_vm13, %v795_v21  ;;  %v4302_v19 = vpack.c.bf16 %v2126_v13, %v2125_v12  ;;  %v2127_v20 = vld [vmem:[%s4803_s7 + $0x60] sm:$0xff]  ;;  %v2128_v21 = vld [vmem:[%s4803_s7 + $0x68] sm:$0xff] }
 0x149   : > { %1992 = vrot.lane.b32.xlu0 %v4134_v52, %s3749_s10  ;;  %2040 = vrot.lane.b32.xlu1 %v4186_v16, %s3741_s29 }
 0x14b   : > { %v1091_v17 = vpop.permute.xlu1 %1090  ;;  %v769_v22 = vpop.permute.xlu0 %768  ;;  %v490_v23 = vld [vmem:[#allocation3 + $0x78] sm:$0xff]  ;;  %v796_v24 = vld [vmem:[#allocation3 + $0x50] sm:$0xff] }
 0x14c   : > { %1096 = vst.msk [vmem:[#allocation3] sm:$0xff] %vm338_vm1, %v1091_v17  ;;  %3303 = vmatmul.mubr.msk.f32.gmra.mrb[14].mxu0 %vm388_vm13, %v490_v23  ;;  %3324 = vmatprep.mubr.msk.f32.mxu1 %vm388_vm13, %v796_v24 }
 0x14d   : > { %773 = vst.msk [vmem:[#allocation3 + $0x68] sm:$0xff] %vm388_vm13, %v769_v22  ;;  %2347 = vrot.lane.b32.xlu0 %v4134_v52, %s3750_s28  ;;  %2395 = vrot.lane.b32.xlu1 %v4186_v16, %s3752_s15 }
 0x14f   : > { %v1093_v25 = vpop.permute.xlu1 %1092  ;;  %v779_v26 = vpop.permute.xlu0 %778  ;;  %v797_v27 = vld [vmem:[#allocation3 + $0x58] sm:$0xff]  ;;  %v798_v28 = vld [vmem:[#allocation3 + $0x60] sm:$0xff] }
 0x150   : > { %1097 = vst.msk [vmem:[#allocation3 + $0x8] sm:$0xff] %vm338_vm1, %v1093_v25  ;;  %3325 = vmatmul.mubr.msk.f32.gmra.mrb[10].mxu1 %vm388_vm13, %v797_v27  ;;  %v4323_v25 = vpack.c.bf16 %v2128_v21, %v2127_v20 }
 0x151   : > { %784 = vst.msk [vmem:[#allocation3 + $0x70] sm:$0xff] %vm388_vm13, %v779_v26  ;;  %1996 = vrot.lane.b32.xlu0 %v4087_v31, %s3749_s10  ;;  %3327 = vmatprep.mubr.msk.f32.mxu1 %vm388_vm13, %v798_v28  ;;  %v2130_v26 = vld [vmem:[%s4803_s7 + $0x78] sm:$0xf] }
 0x152   : > { %2044 = vrot.lane.b32.xlu1 %v4204_v29, %s3741_s29 }
 0x153   : > { %v1103_v32 = vpop.permute.xlu1 %1102  ;;  %v781_v33 = vpop.permute.xlu0 %780  ;;  %v1214_v35 = vld [vmem:[#allocation3] sm:$0xff] }
 0x154   : > { %v799_v34 = vld [vmem:[#allocation3 + $0x68] sm:$0xff]  ;;  %1108 = vst.msk [vmem:[#allocation3 + $0x10] sm:$0xff] %vm338_vm1, %v1103_v32  ;;  %3349 = vmatprep.mubr.msk.f32.mxu0 %vm338_vm1, %v1214_v35 }
 0x155   : > { %785 = vst.msk [vmem:[#allocation3 + $0x78] sm:$0xff] %vm388_vm13, %v781_v33  ;;  %3328 = vmatmul.mubr.msk.f32.gmra.mrb[12].mxu1 %vm388_vm13, %v799_v34  ;;  %2351 = vrot.lane.b32.xlu0 %v4087_v31, %s3750_s28 }
 0x156   : > { %2399 = vrot.lane.b32.xlu1 %v4204_v29, %s3752_s15 }
 0x157   : > { %v1105_v42 = vpop.permute.xlu1 %1104  ;;  %v1115_v43 = vpop.permute.xlu0 %1114  ;;  %v1215_v46 = vld [vmem:[#allocation3 + $0x8] sm:$0xff] }
 0x158   : > { %v800_v45 = vld [vmem:[#allocation3 + $0x70] sm:$0xff]  ;;  %1109 = vst.msk [vmem:[#allocation3 + $0x18] sm:$0xff] %vm338_vm1, %v1105_v42  ;;  %1120 = vst.msk [vmem:[#allocation3 + $0x20] sm:$0xff] %vm338_vm1, %v1115_v43  ;;  %3350 = vmatmul.mubr.msk.f32.vlgmr.msra.gmra.mrb[16].mxu0 %vm338_vm1, %v1215_v46 }
 0x159   : > { %3330 = vmatprep.mubr.msk.f32.mxu1 %vm388_vm13, %v800_v45  ;;  %2015 = vrot.lane.b32.xlu0 %v4134_v52, %s3739_s27 }
 0x15a   : > { %3576 = vmatpush3.bf16.msra.mxu0 %v4102_v40  ;;  %2063 = vrot.lane.b32.xlu1 %v4186_v16, %s3742_s11 }
 0x15b   : > { %3578 = vmatprep.subr.bf16.mxu0 %v4228_v37  ;;  %v1439_v49 = vpop.permute.xlu1 %1438  ;;  %v1117_v50 = vpop.permute.xlu0 %1116  ;;  %v1216_v53 = vld [vmem:[#allocation3 + $0x10] sm:$0xff] }
 0x15c   : > { %v801_v51 = vld [vmem:[#allocation3 + $0x78] sm:$0xff]  ;;  %1444 = vst.msk [vmem:[#allocation3] sm:$0xff] %vm338_vm1, %v1439_v49  ;;  %1121 = vst.msk [vmem:[#allocation3 + $0x28] sm:$0xff] %vm338_vm1, %v1117_v50  ;;  %3352 = vmatprep.mubr.msk.f32.mxu0 %vm338_vm1, %v1216_v53 }
 0x15d   : > { %3331 = vmatmul.mubr.msk.f32.gmra.mrb[14].mxu1 %vm388_vm13, %v801_v51  ;;  %2370 = vrot.lane.b32.xlu0 %v4134_v52, %s3751_s26  ;;  %v2531_v50 = vld [vmem:[%s4803_s7 + $0x78] sm:$0xf]  ;;  %vm2424_vm13 = vcmask 752640  }
 0x15e   : > { %3580 = vmatpush3.bf16.msra.mxu0 %v4228_v37  ;;  %2418 = vrot.lane.b32.xlu1 %v4186_v16, %s3743_s12 }
 0x15f   : > { %3582 = vmatprep.subr.bf16.mxu0 %v4246_v48  ;;  %v1441_v57 = vpop.permute.xlu1 %1440  ;;  %v1127_v58 = vpop.permute.xlu0 %1126  ;;  %v1217_v2 = vld [vmem:[#allocation3 + $0x18] sm:$0xff]  ;;  %v1218_v3 = vld [vmem:[#allocation3 + $0x20] sm:$0xff] }
 0x160   : > { %1445 = vst.msk [vmem:[#allocation3 + $0x8] sm:$0xff] %vm338_vm1, %v1441_v57  ;;  %1132 = vst.msk [vmem:[#allocation3 + $0x30] sm:$0xff] %vm338_vm1, %v1127_v58  ;;  %3353 = vmatmul.mubr.msk.f32.gmra.mrb[18].mxu0 %vm338_vm1, %v1217_v2 }
 0x161   : > { %2019 = vrot.lane.b32.xlu0 %v4087_v31, %s3739_s27  ;;  %3355 = vmatprep.mubr.msk.f32.mxu0 %vm338_vm1, %v1218_v3 }
 0x162   : > { %2067 = vrot.lane.b32.xlu1 %v4204_v29, %s3742_s11  ;;  %3584 = vmatpush3.bf16.msra.mxu0 %v4246_v48 }
 0x163   : > { %v1451_v6 = vpop.permute.xlu1 %1450  ;;  %v1129_v7 = vpop.permute.xlu0 %1128  ;;  %v1219_v8 = vld [vmem:[#allocation3 + $0x28] sm:$0xff]  ;;  %v1563_v9 = vld [vmem:[#allocation3] sm:$0xff]  ;;  %3586 = vmatprep.subr.bf16.mxu0 %v4264_v4 }
 0x164   : > { %1456 = vst.msk [vmem:[#allocation3 + $0x10] sm:$0xff] %vm338_vm1, %v1451_v6  ;;  %1133 = vst.msk [vmem:[#allocation3 + $0x38] sm:$0xff] %vm338_vm1, %v1129_v7  ;;  %3356 = vmatmul.mubr.msk.f32.gmra.mrb[20].mxu0 %vm338_vm1, %v1219_v8  ;;  %3389 = vmatprep.mubr.msk.f32.mxu1 %vm338_vm1, %v1563_v9 }
 0x165   : > { %1936 = vst.msk [vmem:[#allocation3] sm:$0xff] %vm1935_vm14, %v4134_v52  ;;  %2374 = vrot.lane.b32.xlu0 %v4087_v31, %s3751_s26  ;;  %s3124_s26 = sshll.u32 (%p3836_p4), %s3824_s6, 4 }
 0x166   : > { %2422 = vrot.lane.b32.xlu1 %v4204_v29, %s3743_s12  ;;  %3588 = vmatpush3.bf16.msra.mxu0 %v4264_v4  ;;  %s2857_s25 = scalar_lea.vmem (%p3836_p4), %s4804_s9, %s3124_s26 }
 0x167   : > { %v1453_v10 = vpop.permute.xlu1 %1452  ;;  %v1139_v14 = vpop.permute.xlu0 %1138  ;;  %v1220_v15 = vld [vmem:[#allocation3 + $0x30] sm:$0xff]  ;;  %v1564_v18 = vld [vmem:[#allocation3 + $0x8] sm:$0xff]  ;;  %3590 = vmatprep.subr.bf16.mxu0 %v4282_v11 }
 0x168   : > { %1457 = vst.msk [vmem:[#allocation3 + $0x18] sm:$0xff] %vm338_vm1, %v1453_v10  ;;  %1144 = vst.msk [vmem:[#allocation3 + $0x40] sm:$0xff] %vm338_vm1, %v1139_v14  ;;  %3358 = vmatprep.mubr.msk.f32.mxu0 %vm338_vm1, %v1220_v15  ;;  %3390 = vmatmul.mubr.msk.f32.vlgmr.msra.gmra.mrb[16].mxu1 %vm338_vm1, %v1564_v18 }
 0x169   : > { %1937 = vst.msk [vmem:[#allocation3 + $0x8] sm:$0xff] %vm1935_vm14, %v4087_v31  ;;  %2038 = vrot.lane.b32.xlu0 %v4134_v52, %s3741_s29  ;;  %3610 = vmatpush3.bf16.msra.mxu1 %v4102_v40  ;;  %v4333_v40 = vld [vmem:[%s4803_s7 + $0x70] sm:$0xff] }
 0x16a   : > { %2086 = vrot.lane.b32.xlu1 %v4186_v16, %s3730_s30  ;;  %3592 = vmatpush3.bf16.msra.mxu0 %v4282_v11  ;;  %v3601_v33 = vpack.c.bf16 %v2130_v26, %v4333_v40  ;;  %v3635_v55 = vpack.c.bf16 %v2531_v50, %v4333_v40 }
 0x16b   : > { %v1463_v17 = vpop.permute.xlu1 %1462  ;;  %v1141_v22 = vpop.permute.xlu0 %1140  ;;  %v1221_v23 = vld [vmem:[#allocation3 + $0x38] sm:$0xff]  ;;  %v1565_v24 = vld [vmem:[#allocation3 + $0x10] sm:$0xff]  ;;  %3594 = vmatprep.subr.bf16.mxu0 %v4302_v19  ;;  %3612 = vmatprep.subr.bf16.mxu1 %v4228_v37 }
 0x16c   : > { %1468 = vst.msk [vmem:[#allocation3 + $0x20] sm:$0xff] %vm338_vm1, %v1463_v17  ;;  %1145 = vst.msk [vmem:[#allocation3 + $0x48] sm:$0xff] %vm338_vm1, %v1141_v22  ;;  %3359 = vmatmul.mubr.msk.f32.gmra.mrb[22].mxu0 %vm338_vm1, %v1221_v23  ;;  %3392 = vmatprep.mubr.msk.f32.mxu1 %vm338_vm1, %v1565_v24 }
 0x16d   : > { %2393 = vrot.lane.b32.xlu0 %v4134_v52, %s3752_s15  ;;  %3614 = vmatpush3.bf16.msra.mxu1 %v4228_v37 }
 0x16e   : > { %2441 = vrot.lane.b32.xlu1 %v4186_v16, %s3744_s17  ;;  %3596 = vmatpush3.bf16.msra.mxu0 %v4302_v19 }
 0x16f   : > { %v1465_v27 = vpop.permute.xlu1 %1464  ;;  %v1155_v28 = vpop.permute.xlu0 %1154  ;;  %v1222_v30 = vld [vmem:[#allocation3 + $0x40] sm:$0xff]  ;;  %v1566_v32 = vld [vmem:[#allocation3 + $0x18] sm:$0xff]  ;;  %3598 = vmatprep.subr.bf16.mxu0 %v4323_v25  ;;  %3616 = vmatprep.subr.bf16.mxu1 %v4246_v48 }
 0x170   : > { %1469 = vst.msk [vmem:[#allocation3 + $0x28] sm:$0xff] %vm338_vm1, %v1465_v27  ;;  %v1162_v34 = vsel %vm343_vm0, %v1155_v28, %v3894_v38  ;;  %3361 = vmatprep.mubr.msk.f32.mxu0 %vm338_vm1, %v1222_v30  ;;  %3393 = vmatmul.mubr.msk.f32.gmra.mrb[18].mxu1 %vm338_vm1, %v1566_v32  ;;  %v2100_v14 = vld [vmem:[#allocation3 + $0x8] sm:$0xff] }
 0x171   : > { %1166 = vst.msk [vmem:[#allocation3 + $0x50] sm:$0xff] %vm338_vm1, %v1162_v34  ;;  %2042 = vrot.lane.b32.xlu0 %v4087_v31, %s3741_s29  ;;  %3618 = vmatpush3.bf16.msra.mxu1 %v4246_v48 }
 0x172   : > { %2090 = vrot.lane.b32.xlu1 %v4204_v29, %s3730_s30  ;;  %3600 = vmatpush3.bf16.msra.mxu0 %v4323_v25 }
 0x173   : > { %v1477_v35 = vpop.permute.xlu1 %1476  ;;  %v1159_v36 = vpop.permute.xlu0 %1158  ;;  %v1223_v37 = vld [vmem:[#allocation3 + $0x48] sm:$0xff]  ;;  %v1567_v38 = vld [vmem:[#allocation3 + $0x20] sm:$0xff]  ;;  %3603 = vmatprep.subr.msk.bf16.mxu0 %vm3905_vm12, %v3601_v33  ;;  %3620 = vmatprep.subr.bf16.mxu1 %v4264_v4 }
 0x174   : > { %1481 = vst.msk [vmem:[#allocation3 + $0x38] sm:$0xff] %vm338_vm1, %v1477_v35  ;;  %v1163_v41 = vsel %vm343_vm0, %v1159_v36, %v3896_v39  ;;  %3362 = vmatmul.mubr.msk.f32.gmra.mrb[24].mxu0 %vm338_vm1, %v1223_v37  ;;  %3395 = vmatprep.mubr.msk.f32.mxu1 %vm338_vm1, %v1567_v38  ;;  %vm1207_vm0 = vcmask 326656  }
 0x175   : > { %1167 = vst.msk [vmem:[#allocation3 + $0x58] sm:$0xff] %vm338_vm1, %v1163_v41  ;;  %2397 = vrot.lane.b32.xlu0 %v4087_v31, %s3752_s15  ;;  %3622 = vmatpush3.bf16.msra.mxu1 %v4264_v4 }
 0x176   : > { %2445 = vrot.lane.b32.xlu1 %v4204_v29, %s3744_s17  ;;  %3606 = vmatpush3.bf16.msk.msra.mxu0 %vm3905_vm12, %v3601_v33 }
 0x177   : > { %v1489_v42 = vpop.permute.xlu1 %1488  ;;  %v1475_v43 = vpop.permute.xlu0 %1474  ;;  %v1568_v39 = vld [vmem:[#allocation3 + $0x28] sm:$0xff]  ;;  %3624 = vmatprep.subr.bf16.mxu1 %v4282_v11 }
 0x178   : > { %1493 = vst.msk [vmem:[#allocation3 + $0x48] sm:$0xff] %vm338_vm1, %v1489_v42  ;;  %1480 = vst.msk [vmem:[#allocation3 + $0x30] sm:$0xff] %vm338_vm1, %v1475_v43  ;;  %3396 = vmatmul.mubr.msk.f32.gmra.mrb[20].mxu1 %vm338_vm1, %v1568_v39  ;;  %v1224_v45 = vld [vmem:[#allocation3 + $0x50] sm:$0xff] }
 0x179   : > { %2061 = vrot.lane.b32.xlu0 %v4134_v52, %s3742_s11  ;;  %3364 = vmatprep.mubr.msk.f32.mxu0 %vm338_vm1, %v1224_v45 }
 0x17a   : > { %2464 = vrot.lane.b32.xlu1 %v4186_v16, %s3745_s20  ;;  %3626 = vmatpush3.bf16.msra.mxu1 %v4282_v11 }
 0x17b   : > { %v4385_v46 = vpop.permute.xlu1 %1531  ;;  %v1177_v47 = vpop.permute.xlu0 %1176  ;;  %3628 = vmatprep.subr.bf16.mxu1 %v4302_v19  ;;  %v1570_v57 = vld [vmem:[#allocation3 + $0x38] sm:$0xff] }
 0x17c   : > { %v1185_v48 = vsel %vm1184_vm15, %v1177_v47, %v3973_v59  ;;  %v1225_v49 = vld [vmem:[#allocation3 + $0x58] sm:$0xff] }
 0x17d   : > { %1189 = vst.msk [vmem:[#allocation3 + $0x60] sm:$0xff] %vm338_vm1, %v1185_v48  ;;  %2416 = vrot.lane.b32.xlu0 %v4134_v52, %s3743_s12  ;;  %3365 = vmatmul.mubr.msk.f32.gmra.mrb[26].mxu0 %vm338_vm1, %v1225_v49 }
 0x17e   : > { %2468 = vrot.lane.b32.xlu1 %v4204_v29, %s3745_s20  ;;  %3630 = vmatpush3.bf16.msra.mxu1 %v4302_v19 }
 0x17f   : > { %v4400_v51 = vpop.permute.xlu1 %1550  ;;  %v1181_v59 = vpop.permute.xlu0 %1180  ;;  %v1569_v53 = vld [vmem:[#allocation3 + $0x30] sm:$0xff]  ;;  %3632 = vmatprep.subr.bf16.mxu1 %v4323_v25  ;;  %v1572_v7 = vld [vmem:[#allocation3 + $0x48] sm:$0xff] }
 0x180   : > { %v1186_v56 = vsel %vm1184_vm15, %v1181_v59, %v3979_v60  ;;  %3398 = vmatprep.mubr.msk.f32.mxu1 %vm338_vm1, %v1569_v53  ;;  %vm2092_vm15 = vcmask 588800  }
 0x181   : > { %1190 = vst.msk [vmem:[#allocation3 + $0x68] sm:$0xff] %vm338_vm1, %v1186_v56  ;;  %2065 = vrot.lane.b32.xlu0 %v4087_v31, %s3742_s11  ;;  %3399 = vmatmul.mubr.msk.f32.gmra.mrb[22].mxu1 %vm338_vm1, %v1570_v57 }
 0x182   : > { %2487 = vrot.lane.b32.xlu1 %v4186_v16, %s4811_s23  ;;  %3634 = vmatpush3.bf16.msra.mxu1 %v4323_v25 }
 0x183   : > { %v4414_v58 = vpop.permute.xlu1 %1948  ;;  %v1487_v2 = vpop.permute.xlu0 %1486  ;;  %3637 = vmatprep.subr.msk.bf16.mxu1 %vm3905_vm12, %v3635_v55 }
 0x184   : > { %1492 = vst.msk [vmem:[#allocation3 + $0x40] sm:$0xff] %vm338_vm1, %v1487_v2  ;;  %v1226_v60 = vld [vmem:[#allocation3 + $0x60] sm:$0xff] }
 0x185   : > { %2420 = vrot.lane.b32.xlu0 %v4087_v31, %s3743_s12  ;;  %3367 = vmatprep.mubr.msk.f32.mxu0 %vm338_vm1, %v1226_v60 }
 0x186   : > { %2491 = vrot.lane.b32.xlu1 %v4204_v29, %s4811_s23  ;;  %3640 = vmatpush3.bf16.msk.msra.mxu1 %vm3905_vm12, %v3635_v55  ;;  %vm2069_vm12 = vcmask 654336  }
 0x187   : > { %v4426_v16 = vpop.permute.xlu1 %1554  ;;  %v1200_v3 = vpop.permute.xlu0 %1199 }
 0x188   : > { %v1208_v4 = vsel %vm1207_vm0, %v1200_v3, %v3989_v61  ;;  %v1227_v54 = vld [vmem:[#allocation3 + $0x68] sm:$0xff] }
 0x189   : > { %1212 = vst.msk [vmem:[#allocation3 + $0x70] sm:$0xff] %vm338_vm1, %v1208_v4  ;;  %2084 = vrot.lane.b32.xlu0 %v4134_v52, %s3730_s30  ;;  %3368 = vmatmul.mubr.msk.f32.gmra.mrb[28].mxu0 %vm338_vm1, %v1227_v54 }
 0x18b   : > { %v4434_v5 = vpop.permute.xlu1 %1952  ;;  %v1503_v29 = vpop.permute.xlu0 %1502  ;;  %v1571_v44 = vld [vmem:[#allocation3 + $0x40] sm:$0xff] }
 0x18c   : > { %v1511_v6 = vsel %vm1510_vm2, %v1503_v29, %v3995_v62  ;;  %3401 = vmatprep.mubr.msk.f32.mxu1 %vm338_vm1, %v1571_v44 }
 0x18d   : > { %1515 = vst.msk [vmem:[#allocation3 + $0x50] sm:$0xff] %vm338_vm1, %v1511_v6  ;;  %2439 = vrot.lane.b32.xlu0 %v4134_v52, %s3744_s17  ;;  %3402 = vmatmul.mubr.msk.f32.gmra.mrb[24].mxu1 %vm338_vm1, %v1572_v7 }
 0x18f   : > { %v4443_v61 = vpop.permute.xlu1 %1971  ;;  %v1204_v8 = vpop.permute.xlu0 %1203 }
 0x190   : > { %v1209_v9 = vsel %vm1207_vm0, %v1204_v8, %v4005_v63  ;;  %v1228_v11 = vld [vmem:[#allocation3 + $0x70] sm:$0xff]  ;;  %vm1039_vm0 = vcmask 15360  }
 0x191   : > { %1213 = vst.msk [vmem:[#allocation3 + $0x78] sm:$0xff] %vm338_vm1, %v1209_v9  ;;  %2088 = vrot.lane.b32.xlu0 %v4087_v31, %s3730_s30  ;;  %3370 = vmatprep.mubr.msk.f32.mxu0 %vm338_vm1, %v1228_v11  ;;  %s324_s30 = sand.u32 1, %s3712_s13  }
 0x192   : > { %s3005_s11 = sshll.u32 %s324_s30, 7 }
 0x193   : > { %v4451_v62 = vpop.permute.xlu1 %1975  ;;  %v1507_v12 = vpop.permute.xlu0 %1506  ;;  %s4558_s13 = scalar_lea.vmem [#allocation6], %s3005_s11 }
 0x194   : > { %v1512_v13 = vsel %vm1510_vm2, %v1507_v12, %v4011_v0  ;;  %v1573_v10 = vld [vmem:[#allocation3 + $0x50] sm:$0xff]  ;;  %v2099_v0 = vld [vmem:[#allocation3] sm:$0xff]  ;;  %vm2447_vm2 = vcmask 687104  }
 0x195   : > { %1516 = vst.msk [vmem:[#allocation3 + $0x58] sm:$0xff] %vm338_vm1, %v1512_v13  ;;  %2443 = vrot.lane.b32.xlu0 %v4087_v31, %s3744_s17  ;;  %3404 = vmatprep.mubr.msk.f32.mxu1 %vm338_vm1, %v1573_v10 }
 0x197   : > { %v2334_v63 = vpop.permute.xlu1 %2333  ;;  %v1526_v15 = vpop.permute.xlu0 %1525 }
 0x198   : > { %2338 = vst.msk [vmem:[#allocation3 + $0x8] sm:$0xff] %vm1935_vm14, %v2334_v63  ;;  %v1534_v18 = vsel %vm1533_vm3, %v1526_v15, %v4021_v1  ;;  %v1229_v19 = vld [vmem:[#allocation3 + $0x78] sm:$0xff] }
 0x199   : > { %1538 = vst.msk [vmem:[#allocation3 + $0x60] sm:$0xff] %vm338_vm1, %v1534_v18  ;;  %2462 = vrot.lane.b32.xlu0 %v4134_v52, %s3745_s20  ;;  %3371 = vmatmul.mubr.msk.f32.gmra.mrb[30].mxu0 %vm338_vm1, %v1229_v19 }
 0x19a   : > { %3445 = vmatprep.mubr.msk.f32.mxu0 %vm1935_vm14, %v2099_v0 }
 0x19b   : > { %v1530_v20 = vpop.permute.xlu0 %1529  ;;  %v1995_v21 = vpop.permute.xlu1 %1994 }
 0x19c   : > { %v1535_v17 = vsel %vm1533_vm3, %v1530_v20, %v4385_v46  ;;  %v1574_v22 = vld [vmem:[#allocation3 + $0x58] sm:$0xff]  ;;  %vm2470_vm3 = vcmask 621568  }
 0x19d   : > { %1539 = vst.msk [vmem:[#allocation3 + $0x68] sm:$0xff] %vm338_vm1, %v1535_v17  ;;  %2466 = vrot.lane.b32.xlu0 %v4087_v31, %s3745_s20  ;;  %3405 = vmatmul.mubr.msk.f32.gmra.mrb[26].mxu1 %vm338_vm1, %v1574_v22  ;;  %s3753_s20 = smov 2  }
 0x19e   : > { %3446 = vmatmul.mubr.msk.f32.vlgmr.msra.gmra.mrb[32].mxu0 %vm1935_vm14, %v2100_v14 }
 0x19f   : > { %v1549_v1 = vpop.permute.xlu0 %1548  ;;  %v2350_v23 = vpop.permute.xlu1 %2349 }
 0x1a0   : > { %v1557_v24 = vsel %vm1556_vm4, %v1549_v1, %v4400_v51  ;;  %v1575_v25 = vld [vmem:[#allocation3 + $0x60] sm:$0xff] }
 0x1a1   : > { %1561 = vst.msk [vmem:[#allocation3 + $0x70] sm:$0xff] %vm338_vm1, %v1557_v24  ;;  %2485 = vrot.lane.b32.xlu0 %v4134_v52, %s4811_s23  ;;  %3407 = vmatprep.mubr.msk.f32.mxu1 %vm338_vm1, %v1575_v25 }
 0x1a3   : > { %v1947_v40 = vpop.permute.xlu0 %1946  ;;  %v1999_v26 = vpop.permute.xlu1 %1998 }
 0x1a4   : > { %v1955_v27 = vsel %vm1954_vm5, %v1947_v40, %v4414_v58  ;;  %v1576_v28 = vld [vmem:[#allocation3 + $0x68] sm:$0xff] }
 0x1a5   : > { %1959 = vst.msk [vmem:[#allocation3 + $0x10] sm:$0xff] %vm1935_vm14, %v1955_v27  ;;  %2489 = vrot.lane.b32.xlu0 %v4087_v31, %s4811_s23  ;;  %3408 = vmatmul.mubr.msk.f32.gmra.mrb[28].mxu1 %vm338_vm1, %v1576_v28  ;;  %v2501_v58 = vld [vmem:[#allocation3 + $0x8] sm:$0xff] }
 0x1a7   : > { %v1553_v30 = vpop.permute.xlu0 %1552  ;;  %v2354_v32 = vpop.permute.xlu1 %2353 }
 0x1a8   : > { %v1558_v52 = vsel %vm1556_vm4, %v1553_v30, %v4426_v16  ;;  %v1577_v33 = vld [vmem:[#allocation3 + $0x70] sm:$0xff]  ;;  %vm2493_vm4 = vcmask 556032  }
 0x1a9   : > { %1562 = vst.msk [vmem:[#allocation3 + $0x78] sm:$0xff] %vm338_vm1, %v1558_v52  ;;  %3410 = vmatprep.mubr.msk.f32.mxu1 %vm338_vm1, %v1577_v33 }
 0x1ab   : > { %v1951_v34 = vpop.permute.xlu0 %1950  ;;  %v2018_v35 = vpop.permute.xlu1 %2017 }
 0x1ac   : > { %v1956_v36 = vsel %vm1954_vm5, %v1951_v34, %v4434_v5  ;;  %v2101_v37 = vld [vmem:[#allocation3 + $0x10] sm:$0xff]  ;;  %vm2831_vm5 = vcmask 31768  }
 0x1ad   : > { %1960 = vst.msk [vmem:[#allocation3 + $0x18] sm:$0xff] %vm1935_vm14, %v1956_v36  ;;  %3448 = vmatprep.mubr.msk.f32.mxu0 %vm1935_vm14, %v2101_v37 }
 0x1af   : > { %v1970_v31 = vpop.permute.xlu0 %1969  ;;  %v2373_v38 = vpop.permute.xlu1 %2372 }
 0x1b0   : > { %v1978_v41 = vsel %vm1977_vm6, %v1970_v31, %v4443_v61  ;;  %v1578_v42 = vld [vmem:[#allocation3 + $0x78] sm:$0xff] }
 0x1b1   : > { %1982 = vst.msk [vmem:[#allocation3 + $0x20] sm:$0xff] %vm1935_vm14, %v1978_v41  ;;  %3411 = vmatmul.mubr.msk.f32.gmra.mrb[30].mxu1 %vm338_vm1, %v1578_v42  ;;  %vm2355_vm1 = vcmask 949248  }
 0x1b3   : > { %v1974_v43 = vpop.permute.xlu0 %1973  ;;  %v2022_v39 = vpop.permute.xlu1 %2021 }
 0x1b4   : > { %v1979_v45 = vsel %vm1977_vm6, %v1974_v43, %v4451_v62  ;;  %v2102_v46 = vld [vmem:[#allocation3 + $0x18] sm:$0xff] }
 0x1b5   : > { %1983 = vst.msk [vmem:[#allocation3 + $0x28] sm:$0xff] %vm1935_vm14, %v1979_v45  ;;  %3449 = vmatmul.mubr.msk.f32.gmra.mrb[34].mxu0 %vm1935_vm14, %v2102_v46 }
 0x1b7   : > { %v2332_v47 = vpop.permute.xlu0 %2331  ;;  %v2377_v48 = vpop.permute.xlu1 %2376 }
 0x1b8   : > { %2337 = vst.msk [vmem:[#allocation3] sm:$0xff] %vm1935_vm14, %v2332_v47  ;;  %v2103_v49 = vld [vmem:[#allocation3 + $0x20] sm:$0xff] }
 0x1b9   : > { %3451 = vmatprep.mubr.msk.f32.mxu0 %vm1935_vm14, %v2103_v49 }
 0x1bb   : > { %v1993_v50 = vpop.permute.xlu0 %1992  ;;  %v2041_v51 = vpop.permute.xlu1 %2040 }
 0x1bc   : > { %v2001_v59 = vsel %vm2000_vm7, %v1993_v50, %v1995_v21  ;;  %v2104_v53 = vld [vmem:[#allocation3 + $0x28] sm:$0xff] }
 0x1bd   : > { %2005 = vst.msk [vmem:[#allocation3 + $0x30] sm:$0xff] %vm1935_vm14, %v2001_v59  ;;  %3452 = vmatmul.mubr.msk.f32.gmra.mrb[36].mxu0 %vm1935_vm14, %v2104_v53  ;;  %v4549_v53 = vld [vmem:[%s4800_s4] ss:$0 sm:$0xff] }
 0x1bf   : > { %v2348_v55 = vpop.permute.xlu0 %2347  ;;  %v2500_v56 = vld [vmem:[#allocation3] sm:$0xff]  ;;  %v2396_v2 = vpop.permute.xlu1 %2395 }
 0x1c0   : > { %v2356_v57 = vsel %vm2355_vm1, %v2348_v55, %v2350_v23  ;;  %3501 = vmatprep.mubr.msk.f32.mxu1 %vm1935_vm14, %v2500_v56 }
 0x1c1   : > { %2360 = vst.msk [vmem:[#allocation3 + $0x10] sm:$0xff] %vm1935_vm14, %v2356_v57  ;;  %3502 = vmatmul.mubr.msk.f32.vlgmr.msra.gmra.mrb[32].mxu1 %vm1935_vm14, %v2501_v58 }
 0x1c3   : > { %v1997_v60 = vpop.permute.xlu0 %1996 }
 0x1c4   : > { %v2002_v16 = vsel %vm2000_vm7, %v1997_v60, %v1999_v26  ;;  %v2105_v3 = vld [vmem:[#allocation3 + $0x30] sm:$0xff]  ;;  %v2045_v4 = vpop.permute.xlu1 %2044 }
 0x1c5   : > { %2006 = vst.msk [vmem:[#allocation3 + $0x38] sm:$0xff] %vm1935_vm14, %v2002_v16  ;;  %3454 = vmatprep.mubr.msk.f32.mxu0 %vm1935_vm14, %v2105_v3 }
 0x1c7   : > { %v2352_v54 = vpop.permute.xlu0 %2351 }
 0x1c8   : > { %v2357_v5 = vsel %vm2355_vm1, %v2352_v54, %v2354_v32  ;;  %v2502_v29 = vld [vmem:[#allocation3 + $0x10] sm:$0xff]  ;;  %v2400_v61 = vpop.permute.xlu1 %2399 }
 0x1c9   : > { %2361 = vst.msk [vmem:[#allocation3 + $0x18] sm:$0xff] %vm1935_vm14, %v2357_v5  ;;  %3504 = vmatprep.mubr.msk.f32.mxu1 %vm1935_vm14, %v2502_v29 }
 0x1cb   : > { %v2016_v44 = vpop.permute.xlu0 %2015 }
 0x1cc   : > { %v2024_v6 = vsel %vm2023_vm8, %v2016_v44, %v2018_v35  ;;  %v2106_v7 = vld [vmem:[#allocation3 + $0x38] sm:$0xff]  ;;  %v2064_v62 = vpop.permute.xlu1 %2063 }
 0x1cd   : > { %2028 = vst.msk [vmem:[#allocation3 + $0x40] sm:$0xff] %vm1935_vm14, %v2024_v6  ;;  %3455 = vmatmul.mubr.msk.f32.gmra.mrb[38].mxu0 %vm1935_vm14, %v2106_v7 }
 0x1cf   : > { %v2371_v8 = vpop.permute.xlu0 %2370 }
 0x1d0   : > { %v2379_v9 = vsel %vm2378_vm9, %v2371_v8, %v2373_v38  ;;  %v2503_v11 = vld [vmem:[#allocation3 + $0x18] sm:$0xff]  ;;  %v2419_v18 = vpop.permute.xlu1 %2418 }
 0x1d1   : > { %2383 = vst.msk [vmem:[#allocation3 + $0x20] sm:$0xff] %vm1935_vm14, %v2379_v9  ;;  %3505 = vmatmul.mubr.msk.f32.gmra.mrb[34].mxu1 %vm1935_vm14, %v2503_v11 }
 0x1d3   : > { %v2020_v12 = vpop.permute.xlu0 %2019 }
 0x1d4   : > { %v2025_v13 = vsel %vm2023_vm8, %v2020_v12, %v2022_v39  ;;  %v2107_v10 = vld [vmem:[#allocation3 + $0x40] sm:$0xff]  ;;  %v2068_v21 = vpop.permute.xlu1 %2067 }
 0x1d5   : > { %2029 = vst.msk [vmem:[#allocation3 + $0x48] sm:$0xff] %vm1935_vm14, %v2025_v13  ;;  %3457 = vmatprep.mubr.msk.f32.mxu0 %vm1935_vm14, %v2107_v10 }
 0x1d7   : > { %v2375_v63 = vpop.permute.xlu0 %2374 }
 0x1d8   : > { %v2380_v14 = vsel %vm2378_vm9, %v2375_v63, %v2377_v48  ;;  %v2504_v15 = vld [vmem:[#allocation3 + $0x20] sm:$0xff]  ;;  %v2423_v40 = vpop.permute.xlu1 %2422 }
 0x1d9   : > { %2384 = vst.msk [vmem:[#allocation3 + $0x28] sm:$0xff] %vm1935_vm14, %v2380_v14  ;;  %3507 = vmatprep.mubr.msk.f32.mxu1 %vm1935_vm14, %v2504_v15 }
 0x1db   : > { %v2039_v19 = vpop.permute.xlu0 %2038 }
 0x1dc   : > { %v2047_v0 = vsel %vm2046_vm10, %v2039_v19, %v2041_v51  ;;  %v2108_v20 = vld [vmem:[#allocation3 + $0x48] sm:$0xff]  ;;  %v2087_v30 = vpop.permute.xlu1 %2086 }
 0x1dd   : > { %2051 = vst.msk [vmem:[#allocation3 + $0x50] sm:$0xff] %vm1935_vm14, %v2047_v0  ;;  %3458 = vmatmul.mubr.msk.f32.gmra.mrb[40].mxu0 %vm1935_vm14, %v2108_v20 }
 0x1df   : > { %v2394_v17 = vpop.permute.xlu0 %2393 }
 0x1e0   : > { %v2402_v22 = vsel %vm2401_vm11, %v2394_v17, %v2396_v2  ;;  %v2505_v1 = vld [vmem:[#allocation3 + $0x28] sm:$0xff]  ;;  %v2442_v38 = vpop.permute.xlu1 %2441 }
 0x1e1   : > { %2406 = vst.msk [vmem:[#allocation3 + $0x30] sm:$0xff] %vm1935_vm14, %v2402_v22  ;;  %3508 = vmatmul.mubr.msk.f32.gmra.mrb[36].mxu1 %vm1935_vm14, %v2505_v1 }
 0x1e3   : > { %v2043_v23 = vpop.permute.xlu0 %2042 }
 0x1e4   : > { %v2048_v24 = vsel %vm2046_vm10, %v2043_v23, %v2045_v4  ;;  %v2109_v25 = vld [vmem:[#allocation3 + $0x50] sm:$0xff]  ;;  %v2091_v46 = vpop.permute.xlu1 %2090 }
 0x1e5   : > { %2052 = vst.msk [vmem:[#allocation3 + $0x58] sm:$0xff] %vm1935_vm14, %v2048_v24  ;;  %3460 = vmatprep.mubr.msk.f32.mxu0 %vm1935_vm14, %v2109_v25 }
 0x1e7   : > { %v2398_v26 = vpop.permute.xlu0 %2397 }
 0x1e8   : > { %v2403_v27 = vsel %vm2401_vm11, %v2398_v26, %v2400_v61  ;;  %v2506_v28 = vld [vmem:[#allocation3 + $0x30] sm:$0xff]  ;;  %v2446_v60 = vpop.permute.xlu1 %2445 }
 0x1e9   : > { %2407 = vst.msk [vmem:[#allocation3 + $0x38] sm:$0xff] %vm1935_vm14, %v2403_v27  ;;  %3510 = vmatprep.mubr.msk.f32.mxu1 %vm1935_vm14, %v2506_v28 }
 0x1eb   : > { %v2062_v32 = vpop.permute.xlu0 %2061 }
 0x1ec   : > { %v2070_v52 = vsel %vm2069_vm12, %v2062_v32, %v2064_v62  ;;  %v2110_v33 = vld [vmem:[#allocation3 + $0x58] sm:$0xff]  ;;  %v2465_v7 = vpop.permute.xlu1 %2464 }
 0x1ed   : > { %2074 = vst.msk [vmem:[#allocation3 + $0x60] sm:$0xff] %vm1935_vm14, %v2070_v52  ;;  %3461 = vmatmul.mubr.msk.f32.gmra.mrb[42].mxu0 %vm1935_vm14, %v2110_v33 }
 0x1ef   : > { %v2417_v34 = vpop.permute.xlu0 %2416  ;;  %v3283_v35 = vpop.f32.mrb[0].mxu0 }
 0x1f0   : > { %v2425_v36 = vsel %vm2424_vm13, %v2417_v34, %v2419_v18  ;;  %v2507_v37 = vld [vmem:[#allocation3 + $0x38] sm:$0xff]  ;;  %v611_v31 = vpop.f32.mrb[1].mxu0  ;;  %v2469_v20 = vpop.permute.xlu1 %2468 }
 0x1f1   : > { %2429 = vst.msk [vmem:[#allocation3 + $0x40] sm:$0xff] %vm1935_vm14, %v2425_v36  ;;  %3511 = vmatmul.mubr.msk.f32.gmra.mrb[38].mxu1 %vm1935_vm14, %v2507_v37 }
 0x1f3   : > { %v2066_v41 = vpop.permute.xlu0 %2065  ;;  %v3286_v42 = vpop.f32.mrb[2].mxu0 }
 0x1f4   : > { %v2071_v43 = vsel %vm2069_vm12, %v2066_v41, %v2068_v21  ;;  %v2111_v39 = vld [vmem:[#allocation3 + $0x60] sm:$0xff]  ;;  %v621_v45 = vpop.f32.mrb[3].mxu0  ;;  %v2488_v26 = vpop.permute.xlu1 %2487 }
 0x1f5   : > { %2075 = vst.msk [vmem:[#allocation3 + $0x68] sm:$0xff] %vm1935_vm14, %v2071_v43  ;;  %3463 = vmatprep.mubr.msk.f32.mxu0 %vm1935_vm14, %v2111_v39 }
 0x1f7   : > { %v4538_v47 = vpop.f32.mrb[4].mxu0  ;;  %v2421_v48 = vpop.permute.xlu0 %2420 }
 0x1f8   : > { %v2426_v49 = vsel %vm2424_vm13, %v2421_v48, %v2423_v40  ;;  %v4542_v50 = vpop.f32.mrb[5].mxu0  ;;  %v2508_v51 = vld [vmem:[#allocation3 + $0x40] sm:$0xff] }
 0x1f9   : > { %2430 = vst.msk [vmem:[#allocation3 + $0x48] sm:$0xff] %vm1935_vm14, %v2426_v49  ;;  %3513 = vmatprep.mubr.msk.f32.mxu1 %vm1935_vm14, %v2508_v51 }
 0x1fb   : > { %v3311_v59 = vpop.f32.mrb[0].mxu1  ;;  %v2085_v55 = vpop.permute.xlu0 %2084 }
 0x1fc   : > { %v1001_v56 = vmax.f32 %v3283_v35, %v3311_v59  ;;  %v2093_v57 = vsel %vm2092_vm15, %v2085_v55, %v2087_v30  ;;  %v921_v58 = vpop.f32.mrb[1].mxu1  ;;  %v2112_v2 = vld [vmem:[#allocation3 + $0x68] sm:$0xff] }
 0x1fd   : > { %2097 = vst.msk [vmem:[#allocation3 + $0x70] sm:$0xff] %vm1935_vm14, %v2093_v57  ;;  %v1000_v16 = vmax.f32 %v611_v31, %v921_v58  ;;  %3464 = vmatmul.mubr.msk.f32.gmra.mrb[44].mxu0 %vm1935_vm14, %v2112_v2 }
 0x1fe   : > { %v1024_v3 = vadd.f32 %v4549_v53, %v1001_v56 }
 0x1ff   : > { %v1023_v4 = vadd.f32 %v4549_v53, %v1000_v16  ;;  %v4556_v54 = vpop.f32.mrb[6].mxu0  ;;  %v2440_v5 = vpop.permute.xlu0 %2439 }
 0x200   : > { %1041 = vst.msk [vmem:[%s4558_s13 + $0x8] sm:$0xff] %vm1039_vm0, %v1024_v3  ;;  %v2448_v29 = vsel %vm2447_vm2, %v2440_v5, %v2442_v38  ;;  %v641_v44 = vpop.f32.mrb[7].mxu0  ;;  %v2509_v6 = vld [vmem:[#allocation3 + $0x48] sm:$0xff] }
 0x201   : > { %1040 = vst.msk [vmem:[%s4558_s13] sm:$0xff] %vm1039_vm0, %v1023_v4  ;;  %3514 = vmatmul.mubr.msk.f32.gmra.mrb[40].mxu1 %vm1935_vm14, %v2509_v6 }
 0x202   : > { %2452 = vst.msk [vmem:[#allocation3 + $0x50] sm:$0xff] %vm1935_vm14, %v2448_v29 }
 0x203   : > { %v3314_v61 = vpop.f32.mrb[2].mxu1  ;;  %v2089_v8 = vpop.permute.xlu0 %2088 }
 0x204   : > { %v1003_v9 = vmax.f32 %v3286_v42, %v3314_v61  ;;  %v2094_v11 = vsel %vm2092_vm15, %v2089_v8, %v2091_v46  ;;  %v931_v62 = vpop.f32.mrb[3].mxu1  ;;  %v2113_v12 = vld [vmem:[#allocation3 + $0x70] sm:$0xff]  ;;  %v2492_v42 = vpop.permute.xlu1 %2491 }
 0x205   : > { %2098 = vst.msk [vmem:[#allocation3 + $0x78] sm:$0xff] %vm1935_vm14, %v2094_v11  ;;  %v1002_v13 = vmax.f32 %v621_v45, %v931_v62  ;;  %3466 = vmatprep.mubr.msk.f32.mxu0 %vm1935_vm14, %v2113_v12 }
 0x206   : > { %v1026_v10 = vadd.f32 %v4549_v53, %v1003_v9 }
 0x207   : > { %v1025_v63 = vadd.f32 %v4549_v53, %v1002_v13  ;;  %v3295_v14 = vpop.f32.mrb[8].mxu0  ;;  %v2444_v15 = vpop.permute.xlu0 %2443 }
 0x208   : > { %1043 = vst.msk [vmem:[%s4558_s13 + $0x18] sm:$0xff] %vm1039_vm0, %v1026_v10  ;;  %v2449_v18 = vsel %vm2447_vm2, %v2444_v15, %v2446_v60  ;;  %v651_v19 = vpop.f32.mrb[9].mxu0 }
 0x209   : > { %v2510_v0 = vld [vmem:[#allocation3 + $0x50] sm:$0xff]  ;;  %1042 = vst.msk [vmem:[%s4558_s13 + $0x10] sm:$0xff] %vm1039_vm0, %v1025_v63 }
 0x20a   : > { %2453 = vst.msk [vmem:[#allocation3 + $0x58] sm:$0xff] %vm1935_vm14, %v2449_v18  ;;  %3516 = vmatprep.mubr.msk.f32.mxu1 %vm1935_vm14, %v2510_v0 }
 0x20b   : > { %v3317_v21 = vpop.f32.mrb[4].mxu1  ;;  %v2463_v17 = vpop.permute.xlu0 %2462 }
 0x20c   : > { %v1005_v22 = vmax.f32 %v4538_v47, %v3317_v21  ;;  %v2471_v1 = vsel %vm2470_vm3, %v2463_v17, %v2465_v7  ;;  %v941_v23 = vpop.f32.mrb[5].mxu1  ;;  %v2114_v24 = vld [vmem:[#allocation3 + $0x78] sm:$0xff] }
 0x20d   : > { %2475 = vst.msk [vmem:[#allocation3 + $0x60] sm:$0xff] %vm1935_vm14, %v2471_v1  ;;  %v1004_v25 = vmax.f32 %v4542_v50, %v941_v23  ;;  %3467 = vmatmul.mubr.msk.f32.gmra.mrb[46].mxu0 %vm1935_vm14, %v2114_v24 }
 0x20e   : > { %v1028_v40 = vadd.f32 %v4549_v53, %v1005_v22  ;;  %v4632_v22 = vld [vmem:[#allocation4] ss:$0 sm:$0xff] }
 0x20f   : > { %v1027_v27 = vadd.f32 %v4549_v53, %v1004_v25  ;;  %v3298_v28 = vpop.f32.mrb[10].mxu0  ;;  %v2467_v30 = vpop.permute.xlu0 %2466 }
 0x210   : > { %1045 = vst.msk [vmem:[%s4558_s13 + $0x28] sm:$0xff] %vm1039_vm0, %v1028_v40  ;;  %v2472_v32 = vsel %vm2470_vm3, %v2467_v30, %v2469_v20  ;;  %v661_v52 = vpop.f32.mrb[11].mxu0 }
 0x211   : > { %v2511_v33 = vld [vmem:[#allocation3 + $0x58] sm:$0xff]  ;;  %1044 = vst.msk [vmem:[%s4558_s13 + $0x20] sm:$0xff] %vm1039_vm0, %v1027_v27 }
 0x212   : > { %2476 = vst.msk [vmem:[#allocation3 + $0x68] sm:$0xff] %vm1935_vm14, %v2472_v32  ;;  %3517 = vmatmul.mubr.msk.f32.gmra.mrb[42].mxu1 %vm1935_vm14, %v2511_v33 }
 0x213   : > { %v3320_v34 = vpop.f32.mrb[6].mxu1  ;;  %v2486_v35 = vpop.permute.xlu0 %2485 }
 0x214   : > { %v1007_v36 = vmax.f32 %v4556_v54, %v3320_v34  ;;  %v2494_v37 = vsel %vm2493_vm4, %v2486_v35, %v2488_v26  ;;  %v951_v31 = vpop.f32.mrb[7].mxu1  ;;  %v2512_v38 = vld [vmem:[#allocation3 + $0x60] sm:$0xff] }
 0x215   : > { %2498 = vst.msk [vmem:[#allocation3 + $0x70] sm:$0xff] %vm1935_vm14, %v2494_v37  ;;  %v1006_v41 = vmax.f32 %v641_v44, %v951_v31  ;;  %3519 = vmatprep.mubr.msk.f32.mxu1 %vm1935_vm14, %v2512_v38 }
 0x216   : > { %v1030_v43 = vadd.f32 %v4549_v53, %v1007_v36 }
 0x217   : > { %v1029_v39 = vadd.f32 %v4549_v53, %v1006_v41  ;;  %v3301_v45 = vpop.f32.mrb[12].mxu0  ;;  %v2490_v46 = vpop.permute.xlu0 %2489 }
 0x218   : > { %1047 = vst.msk [vmem:[%s4558_s13 + $0x38] sm:$0xff] %vm1039_vm0, %v1030_v43  ;;  %v2495_v47 = vsel %vm2493_vm4, %v2490_v46, %v2492_v42  ;;  %v671_v48 = vpop.f32.mrb[13].mxu0 }
 0x219   : > { %v2513_v49 = vld [vmem:[#allocation3 + $0x68] sm:$0xff]  ;;  %1046 = vst.msk [vmem:[%s4558_s13 + $0x30] sm:$0xff] %vm1039_vm0, %v1029_v39 }
 0x21a   : > { %2499 = vst.msk [vmem:[#allocation3 + $0x78] sm:$0xff] %vm1935_vm14, %v2495_v47  ;;  %3520 = vmatmul.mubr.msk.f32.gmra.mrb[44].mxu1 %vm1935_vm14, %v2513_v49 }
 0x21b   : > { %v3323_v50 = vpop.f32.mrb[8].mxu1 }
 0x21c   : > { %v1009_v51 = vmax.f32 %v3295_v14, %v3323_v50  ;;  %v961_v59 = vpop.f32.mrb[9].mxu1  ;;  %v2514_v55 = vld [vmem:[#allocation3 + $0x70] sm:$0xff] }
 0x21d   : > { %v1008_v56 = vmax.f32 %v651_v19, %v961_v59  ;;  %3522 = vmatprep.mubr.msk.f32.mxu1 %vm1935_vm14, %v2514_v55 }
 0x21e   : > { %v1032_v57 = vadd.f32 %v4549_v53, %v1009_v51 }
 0x21f   : > { %v1031_v58 = vadd.f32 %v4549_v53, %v1008_v56  ;;  %v3304_v2 = vpop.f32.mrb[14].mxu0 }
 0x220   : > { %1049 = vst.msk [vmem:[%s4558_s13 + $0x48] sm:$0xff] %vm1039_vm0, %v1032_v57  ;;  %v681_v60 = vpop.f32.mrb[15].mxu0 }
 0x221   : > { %v2515_v16 = vld [vmem:[#allocation3 + $0x78] sm:$0xff]  ;;  %1048 = vst.msk [vmem:[%s4558_s13 + $0x40] sm:$0xff] %vm1039_vm0, %v1031_v58 }
 0x222   : > { %3523 = vmatmul.mubr.msk.f32.gmra.mrb[46].mxu1 %vm1935_vm14, %v2515_v16  ;;  %vm1886_vm14 = vcmask 23568  }
 0x223   : > { %v3326_v3 = vpop.f32.mrb[10].mxu1 }
 0x224   : > { %v1011_v4 = vmax.f32 %v3298_v28, %v3326_v3  ;;  %v971_v54 = vpop.f32.mrb[11].mxu1 }
 0x225   : > { %v1010_v5 = vmax.f32 %v661_v52, %v971_v54 }
 0x226   : > { %v1034_v29 = vadd.f32 %v4549_v53, %v1011_v4 }
 0x227   : > { %v1033_v44 = vadd.f32 %v4549_v53, %v1010_v5 }
 0x228   : > { %v3329_v6 = vpop.f32.mrb[12].mxu1  ;;  %1051 = vst.msk [vmem:[%s4558_s13 + $0x58] sm:$0xff] %vm1039_vm0, %v1034_v29 }
 0x229   : > { %v1013_v7 = vmax.f32 %v3301_v45, %v3329_v6  ;;  %v981_v61 = vpop.f32.mrb[13].mxu1  ;;  %1050 = vst.msk [vmem:[%s4558_s13 + $0x50] sm:$0xff] %vm1039_vm0, %v1033_v44 }
 0x22a   : > { %v1012_v8 = vmax.f32 %v671_v48, %v981_v61 }
 0x22b   : > { %v1036_v9 = vadd.f32 %v4549_v53, %v1013_v7  ;;  %v3351_v62 = vpop.f32.mrb[16].mxu0 }
 0x22c   : > { %v1035_v11 = vadd.f32 %v4549_v53, %v1012_v8  ;;  %v1355_v12 = vpop.f32.mrb[17].mxu0 }
 0x22d   : > { %1053 = vst.msk [vmem:[%s4558_s13 + $0x68] sm:$0xff] %vm1039_vm0, %v1036_v9 }
 0x22e   : > { %1052 = vst.msk [vmem:[%s4558_s13 + $0x60] sm:$0xff] %vm1039_vm0, %v1035_v11 }
 0x230   : > { %v3332_v13 = vpop.f32.mrb[14].mxu1 }
 0x231   : > { %v1015_v10 = vmax.f32 %v3304_v2, %v3332_v13  ;;  %v991_v63 = vpop.f32.mrb[15].mxu1 }
 0x232   : > { %v1014_v14 = vmax.f32 %v681_v60, %v991_v63 }
 0x233   : > { %v1038_v15 = vadd.f32 %v4549_v53, %v1015_v10  ;;  %v3354_v19 = vpop.f32.mrb[18].mxu0 }
 0x234   : > { %v1037_v18 = vadd.f32 %v4549_v53, %v1014_v14  ;;  %v1365_v0 = vpop.f32.mrb[19].mxu0 }
 0x235   : > { %1055 = vst.msk [vmem:[%s4558_s13 + $0x78] sm:$0xff] %vm1039_vm0, %v1038_v15 }
 0x236   : > { %1054 = vst.msk [vmem:[%s4558_s13 + $0x70] sm:$0xff] %vm1039_vm0, %v1037_v18 }
 0x237   : > { %v3357_v20 = vpop.f32.mrb[20].mxu0 }
 0x238   : > { %v1375_v21 = vpop.f32.mrb[21].mxu0 }
 0x23b   : > { %v3391_v17 = vpop.f32.mrb[16].mxu1 }
 0x23c   : > { %v1784_v1 = vmax.f32 %v3351_v62, %v3391_v17  ;;  %v1704_v23 = vpop.f32.mrb[17].mxu1 }
 0x23d   : > { %v1783_v24 = vmax.f32 %v1355_v12, %v1704_v23  ;;  %v4666_v23 = vld [vmem:[#allocation5] ss:$0 sm:$0xff] }
 0x23e   : > { %v1807_v25 = vadd.f32 %v4632_v22, %v1784_v1 }
 0x23f   : > { %v1806_v40 = vadd.f32 %v4632_v22, %v1783_v24  ;;  %v3360_v26 = vpop.f32.mrb[22].mxu0 }
 0x240   : > { %1840 = vrot.lane.b32.xlu1 %v1807_v25, %s3753_s20  ;;  %v1385_v53 = vpop.f32.mrb[23].mxu0 }
 0x241   : > { %1838 = vrot.lane.b32.xlu0 %v1806_v40, %s3753_s20 }
 0x243   : > { %v3394_v27 = vpop.f32.mrb[18].mxu1 }
 0x244   : > { %v1786_v28 = vmax.f32 %v3354_v19, %v3394_v27  ;;  %v1714_v30 = vpop.f32.mrb[19].mxu1 }
 0x245   : > { %v1785_v32 = vmax.f32 %v1365_v0, %v1714_v30 }
 0x246   : > { %v1809_v52 = vadd.f32 %v4632_v22, %v1786_v28 }
 0x247   : > { %v1808_v33 = vadd.f32 %v4632_v22, %v1785_v32  ;;  %v3363_v34 = vpop.f32.mrb[24].mxu0 }
 0x248   : > { %1844 = vrot.lane.b32.xlu1 %v1809_v52, %s3753_s20  ;;  %v1395_v35 = vpop.f32.mrb[25].mxu0 }
 0x249   : > { %1842 = vrot.lane.b32.xlu0 %v1808_v33, %s3753_s20 }
 0x24b   : > { %v3397_v36 = vpop.f32.mrb[20].mxu1 }
 0x24c   : > { %v1788_v37 = vmax.f32 %v3357_v20, %v3397_v36  ;;  %v1724_v31 = vpop.f32.mrb[21].mxu1 }
 0x24d   : > { %v1787_v38 = vmax.f32 %v1375_v21, %v1724_v31 }
 0x24e   : > { %v1811_v41 = vadd.f32 %v4632_v22, %v1788_v37 }
 0x24f   : > { %v1810_v42 = vadd.f32 %v4632_v22, %v1787_v38 }
 0x250   : > { %1848 = vrot.lane.b32.xlu1 %v1811_v41, %s3753_s20  ;;  %v3366_v43 = vpop.f32.mrb[26].mxu0 }
 0x251   : > { %1846 = vrot.lane.b32.xlu0 %v1810_v42, %s3753_s20  ;;  %v1405_v39 = vpop.f32.mrb[27].mxu0 }
 0x254   : > { %v3400_v45 = vpop.f32.mrb[22].mxu1 }
 0x255   : > { %v1790_v46 = vmax.f32 %v3360_v26, %v3400_v45  ;;  %v1734_v47 = vpop.f32.mrb[23].mxu1 }
 0x256   : > { %v1789_v48 = vmax.f32 %v1385_v53, %v1734_v47 }
 0x257   : > { %v1813_v49 = vadd.f32 %v4632_v22, %v1790_v46 }
 0x258   : > { %v1812_v50 = vadd.f32 %v4632_v22, %v1789_v48 }
 0x259   : > { %1852 = vrot.lane.b32.xlu1 %v1813_v49, %s3753_s20 }
 0x25a   : > { %1850 = vrot.lane.b32.xlu0 %v1812_v50, %s3753_s20 }
 0x25c   : > { %v3369_v51 = vpop.f32.mrb[28].mxu0 }
 0x25d   : > { %v1415_v59 = vpop.f32.mrb[29].mxu0 }
 0x260   : > { %v3403_v55 = vpop.f32.mrb[24].mxu1 }
 0x261   : > { %v1792_v56 = vmax.f32 %v3363_v34, %v3403_v55  ;;  %v1744_v57 = vpop.f32.mrb[25].mxu1 }
 0x262   : > { %v1791_v58 = vmax.f32 %v1395_v35, %v1744_v57 }
 0x263   : > { %v1815_v2 = vadd.f32 %v4632_v22, %v1792_v56 }
 0x264   : > { %v1814_v60 = vadd.f32 %v4632_v22, %v1791_v58 }
 0x265   : > { %1856 = vrot.lane.b32.xlu1 %v1815_v2, %s3753_s20 }
 0x266   : > { %1854 = vrot.lane.b32.xlu0 %v1814_v60, %s3753_s20 }
 0x26c   : > { %v3372_v16 = vpop.f32.mrb[30].mxu0 }
 0x26d   : > { %v1425_v3 = vpop.f32.mrb[31].mxu0 }
 0x270   : > { %v3406_v4 = vpop.f32.mrb[26].mxu1 }
 0x271   : > { %v1794_v54 = vmax.f32 %v3366_v43, %v3406_v4  ;;  %v3447_v5 = vpop.f32.mrb[32].mxu0  ;;  %v1754_v29 = vpop.f32.mrb[27].mxu1 }
 0x272   : > { %v1793_v44 = vmax.f32 %v1405_v39, %v1754_v29  ;;  %v2248_v6 = vpop.f32.mrb[33].mxu0 }
 0x273   : > { %v1817_v7 = vadd.f32 %v4632_v22, %v1794_v54 }
 0x274   : > { %v1816_v61 = vadd.f32 %v4632_v22, %v1793_v44 }
 0x275   : > { %1860 = vrot.lane.b32.xlu1 %v1817_v7, %s3753_s20 }
 0x276   : > { %1858 = vrot.lane.b32.xlu0 %v1816_v61, %s3753_s20 }
 0x278   : > { %v3409_v8 = vpop.f32.mrb[28].mxu1 }
 0x279   : > { %v1796_v9 = vmax.f32 %v3369_v51, %v3409_v8  ;;  %v1764_v11 = vpop.f32.mrb[29].mxu1 }
 0x27a   : > { %v1795_v62 = vmax.f32 %v1415_v59, %v1764_v11 }
 0x27b   : > { %v1819_v12 = vadd.f32 %v4632_v22, %v1796_v9 }
 0x27c   : > { %v1818_v13 = vadd.f32 %v4632_v22, %v1795_v62 }
 0x27d   : > { %1864 = vrot.lane.b32.xlu1 %v1819_v12, %s3753_s20 }
 0x27e   : > { %1862 = vrot.lane.b32.xlu0 %v1818_v13, %s3753_s20 }
 0x284   : > { %v3412_v10 = vpop.f32.mrb[30].mxu1 }
 0x285   : > { %v1798_v63 = vmax.f32 %v3372_v16, %v3412_v10  ;;  %v1774_v14 = vpop.f32.mrb[31].mxu1 }
 0x286   : > { %v1797_v15 = vmax.f32 %v1425_v3, %v1774_v14 }
 0x287   : > { %v1821_v18 = vadd.f32 %v4632_v22, %v1798_v63 }
 0x288   : > { %v1820_v19 = vadd.f32 %v4632_v22, %v1797_v15  ;;  %v3450_v0 = vpop.f32.mrb[34].mxu0 }
 0x289   : > { %1868 = vrot.lane.b32.xlu1 %v1821_v18, %s3753_s20  ;;  %v2258_v20 = vpop.f32.mrb[35].mxu0 }
 0x28a   : > { %1866 = vrot.lane.b32.xlu0 %v1820_v19, %s3753_s20 }
 0x290   : > { %v3453_v21 = vpop.f32.mrb[36].mxu0 }
 0x291   : > { %v2268_v17 = vpop.f32.mrb[37].mxu0 }
 0x294   : > { %v3503_v1 = vpop.f32.mrb[32].mxu1 }
 0x295   : > { %v2729_v24 = vmax.f32 %v3447_v5, %v3503_v1  ;;  %v2649_v25 = vpop.f32.mrb[33].mxu1 }
 0x296   : > { %v2728_v40 = vmax.f32 %v2248_v6, %v2649_v25 }
 0x297   : > { %v2752_v26 = vadd.f32 %v4666_v23, %v2729_v24 }
 0x298   : > { %v2751_v53 = vadd.f32 %v4666_v23, %v2728_v40 }
 0x299   : > { %2785 = vrot.lane.b32.xlu1 %v2752_v26, %s3754_s21 }
 0x29a   : > { %2783 = vrot.lane.b32.xlu0 %v2751_v53, %s3754_s21 }
 0x2a0   : > { %v3456_v22 = vpop.f32.mrb[38].mxu0 }
 0x2a1   : > { %v2278_v27 = vpop.f32.mrb[39].mxu0 }
 0x2a4   : > { %v3506_v28 = vpop.f32.mrb[34].mxu1 }
 0x2a5   : > { %v2731_v30 = vmax.f32 %v3450_v0, %v3506_v28  ;;  %v2659_v32 = vpop.f32.mrb[35].mxu1 }
 0x2a6   : > { %v2730_v52 = vmax.f32 %v2258_v20, %v2659_v32 }
 0x2a7   : > { %v2754_v33 = vadd.f32 %v4666_v23, %v2731_v30 }
 0x2a8   : > { %v2753_v34 = vadd.f32 %v4666_v23, %v2730_v52 }
 0x2a9   : > { %2789 = vrot.lane.b32.xlu1 %v2754_v33, %s3754_s21 }
 0x2aa   : > { %2787 = vrot.lane.b32.xlu0 %v2753_v34, %s3754_s21 }
 0x2b0   : > { %v3459_v35 = vpop.f32.mrb[40].mxu0 }
 0x2b1   : > { %v2288_v36 = vpop.f32.mrb[41].mxu0 }
 0x2b2   : > { %v1841_v37 = vpop.permute.xlu1 %1840 }
 0x2b3   : > { %1888 = vst.msk [vmem:[%s4558_s13 + $0x8] sm:$0xff] %vm1886_vm14, %v1841_v37  ;;  %v1839_v31 = vpop.permute.xlu0 %1838 }
 0x2b4   : > { %1887 = vst.msk [vmem:[%s4558_s13] sm:$0xff] %vm1886_vm14, %v1839_v31  ;;  %v3509_v38 = vpop.f32.mrb[36].mxu1 }
 0x2b5   : > { %v2733_v41 = vmax.f32 %v3453_v21, %v3509_v38  ;;  %v2669_v42 = vpop.f32.mrb[37].mxu1 }
 0x2b6   : > { %v2732_v43 = vmax.f32 %v2268_v17, %v2669_v42 }
 0x2b7   : > { %v2756_v39 = vadd.f32 %v4666_v23, %v2733_v41 }
 0x2b8   : > { %v2755_v45 = vadd.f32 %v4666_v23, %v2732_v43 }
 0x2b9   : > { %2793 = vrot.lane.b32.xlu1 %v2756_v39, %s3754_s21 }
 0x2ba   : > { %v1845_v46 = vpop.permute.xlu1 %1844  ;;  %2791 = vrot.lane.b32.xlu0 %v2755_v45, %s3754_s21 }
 0x2bb   : > { %1890 = vst.msk [vmem:[%s4558_s13 + $0x18] sm:$0xff] %vm1886_vm14, %v1845_v46  ;;  %v1843_v47 = vpop.permute.xlu0 %1842 }
 0x2bc   : > { %1889 = vst.msk [vmem:[%s4558_s13 + $0x10] sm:$0xff] %vm1886_vm14, %v1843_v47 }
 0x2c0   : > { %v3462_v48 = vpop.f32.mrb[42].mxu0 }
 0x2c1   : > { %v2298_v49 = vpop.f32.mrb[43].mxu0 }
 0x2c2   : > { %v1849_v50 = vpop.permute.xlu1 %1848 }
 0x2c3   : > { %1892 = vst.msk [vmem:[%s4558_s13 + $0x28] sm:$0xff] %vm1886_vm14, %v1849_v50  ;;  %v1847_v51 = vpop.permute.xlu0 %1846 }
 0x2c4   : > { %1891 = vst.msk [vmem:[%s4558_s13 + $0x20] sm:$0xff] %vm1886_vm14, %v1847_v51  ;;  %v3512_v59 = vpop.f32.mrb[38].mxu1 }
 0x2c5   : > { %v2735_v55 = vmax.f32 %v3456_v22, %v3512_v59  ;;  %v2679_v56 = vpop.f32.mrb[39].mxu1 }
 0x2c6   : > { %v2734_v57 = vmax.f32 %v2278_v27, %v2679_v56 }
 0x2c7   : > { %v2758_v58 = vadd.f32 %v4666_v23, %v2735_v55 }
 0x2c8   : > { %v2757_v2 = vadd.f32 %v4666_v23, %v2734_v57 }
 0x2c9   : > { %2797 = vrot.lane.b32.xlu1 %v2758_v58, %s3754_s21 }
 0x2ca   : > { %2795 = vrot.lane.b32.xlu0 %v2757_v2, %s3754_s21 }
 0x2cb   : > { %v1853_v60 = vpop.permute.xlu1 %1852 }
 0x2cc   : > { %1894 = vst.msk [vmem:[%s4558_s13 + $0x38] sm:$0xff] %vm1886_vm14, %v1853_v60  ;;  %v1851_v16 = vpop.permute.xlu0 %1850 }
 0x2cd   : > { %1893 = vst.msk [vmem:[%s4558_s13 + $0x30] sm:$0xff] %vm1886_vm14, %v1851_v16 }
 0x2d0   : > { %v3465_v3 = vpop.f32.mrb[44].mxu0 }
 0x2d1   : > { %v2308_v4 = vpop.f32.mrb[45].mxu0 }
 0x2d4   : > { %v3515_v54 = vpop.f32.mrb[40].mxu1 }
 0x2d5   : > { %v2737_v5 = vmax.f32 %v3459_v35, %v3515_v54  ;;  %v2689_v29 = vpop.f32.mrb[41].mxu1 }
 0x2d6   : > { %v2736_v44 = vmax.f32 %v2288_v36, %v2689_v29 }
 0x2d7   : > { %v2760_v6 = vadd.f32 %v4666_v23, %v2737_v5  ;;  %v1857_v7 = vpop.permute.xlu1 %1856 }
 0x2d8   : > { %v2759_v61 = vadd.f32 %v4666_v23, %v2736_v44  ;;  %1896 = vst.msk [vmem:[%s4558_s13 + $0x48] sm:$0xff] %vm1886_vm14, %v1857_v7  ;;  %v1855_v8 = vpop.permute.xlu0 %1854 }
 0x2d9   : > { %1895 = vst.msk [vmem:[%s4558_s13 + $0x40] sm:$0xff] %vm1886_vm14, %v1855_v8  ;;  %2801 = vrot.lane.b32.xlu1 %v2760_v6, %s3754_s21 }
 0x2da   : > { %2799 = vrot.lane.b32.xlu0 %v2759_v61, %s3754_s21 }
 0x2e0   : > { %v3468_v9 = vpop.f32.mrb[46].mxu0 }
 0x2e1   : > { %v2318_v11 = vpop.f32.mrb[47].mxu0 }
 0x2e5   : > { %v3518_v62 = vpop.f32.mrb[42].mxu1 }
 0x2e6   : > { %v2739_v12 = vmax.f32 %v3462_v48, %v3518_v62  ;;  %v2699_v13 = vpop.f32.mrb[43].mxu1 }
 0x2e7   : > { %v2738_v10 = vmax.f32 %v2298_v49, %v2699_v13  ;;  %v1861_v14 = vpop.permute.xlu1 %1860 }
 0x2e8   : > { %v2762_v63 = vadd.f32 %v4666_v23, %v2739_v12  ;;  %1898 = vst.msk [vmem:[%s4558_s13 + $0x58] sm:$0xff] %vm1886_vm14, %v1861_v14  ;;  %v1859_v18 = vpop.permute.xlu0 %1858 }
 0x2e9   : > { %v2761_v15 = vadd.f32 %v4666_v23, %v2738_v10  ;;  %1897 = vst.msk [vmem:[%s4558_s13 + $0x50] sm:$0xff] %vm1886_vm14, %v1859_v18 }
 0x2ea   : > { %2805 = vrot.lane.b32.xlu1 %v2762_v63, %s3754_s21 }
 0x2eb   : > { %2803 = vrot.lane.b32.xlu0 %v2761_v15, %s3754_s21 }
 0x2ed   : > { %v3521_v19 = vpop.f32.mrb[44].mxu1 }
 0x2ee   : > { %v2741_v0 = vmax.f32 %v3465_v3, %v3521_v19  ;;  %v2709_v20 = vpop.f32.mrb[45].mxu1 }
 0x2ef   : > { %v2740_v21 = vmax.f32 %v2308_v4, %v2709_v20  ;;  %v1865_v1 = vpop.permute.xlu1 %1864 }
 0x2f0   : > { %v2764_v17 = vadd.f32 %v4666_v23, %v2741_v0  ;;  %1900 = vst.msk [vmem:[%s4558_s13 + $0x68] sm:$0xff] %vm1886_vm14, %v1865_v1  ;;  %v1863_v25 = vpop.permute.xlu0 %1862 }
 0x2f1   : > { %v2763_v24 = vadd.f32 %v4666_v23, %v2740_v21  ;;  %1899 = vst.msk [vmem:[%s4558_s13 + $0x60] sm:$0xff] %vm1886_vm14, %v1863_v25 }
 0x2f2   : > { %2809 = vrot.lane.b32.xlu1 %v2764_v17, %s3754_s21 }
 0x2f3   : > { %2807 = vrot.lane.b32.xlu0 %v2763_v24, %s3754_s21 }
 0x2f5   : > { %v3524_v40 = vpop.f32.mrb[46].mxu1 }
 0x2f6   : > { %v2743_v26 = vmax.f32 %v3468_v9, %v3524_v40  ;;  %v2719_v53 = vpop.f32.mrb[47].mxu1 }
 0x2f7   : > { %v2742_v22 = vmax.f32 %v2318_v11, %v2719_v53 }
 0x2f8   : > { %v2766_v27 = vadd.f32 %v4666_v23, %v2743_v26 }
 0x2f9   : > { %v2765_v28 = vadd.f32 %v4666_v23, %v2742_v22 }
 0x2fa   : > { %2813 = vrot.lane.b32.xlu1 %v2766_v27, %s3754_s21 }
 0x2fb   : > { %2811 = vrot.lane.b32.xlu0 %v2765_v28, %s3754_s21  ;;  %v1869_v30 = vpop.permute.xlu1 %1868 }
 0x2fc   : > { %1902 = vst.msk [vmem:[%s4558_s13 + $0x78] sm:$0xff] %vm1886_vm14, %v1869_v30  ;;  %v1867_v32 = vpop.permute.xlu0 %1866 }
 0x2fd   : > { %1901 = vst.msk [vmem:[%s4558_s13 + $0x70] sm:$0xff] %vm1886_vm14, %v1867_v32 }
 0x30b   : > { %v2786_v52 = vpop.permute.xlu1 %2785 }
 0x30c   : > { %2833 = vst.msk [vmem:[%s4558_s13 + $0x8] sm:$0xff] %vm2831_vm5, %v2786_v52  ;;  %v2784_v23 = vpop.permute.xlu0 %2783 }
 0x30d   : > { %2832 = vst.msk [vmem:[%s4558_s13] sm:$0xff] %vm2831_vm5, %v2784_v23 }
 0x313   : > { %v2917_v49 = vld [vmem:[%s4558_s13 + $0x8] sm:$0xff] (%p3836_p4) }
 0x314   : > { %v2915_v48 = vld [vmem:[%s4558_s13] sm:$0xff] (%p3836_p4)  ;;  %2918 = vst [vmem:[%s2857_s25 + $0x8] sm:$0xff] (%p3836_p4), %v2917_v49 }
 0x315   : > { %2916 = vst [vmem:[%s2857_s25] sm:$0xff] (%p3836_p4), %v2915_v48 }
 0x31b   : > { %v2790_v33 = vpop.permute.xlu1 %2789 }
 0x31c   : > { %2835 = vst.msk [vmem:[%s4558_s13 + $0x18] sm:$0xff] %vm2831_vm5, %v2790_v33  ;;  %v2788_v34 = vpop.permute.xlu0 %2787 }
 0x31d   : > { %2834 = vst.msk [vmem:[%s4558_s13 + $0x10] sm:$0xff] %vm2831_vm5, %v2788_v34 }
 0x323   : > { %v2921_v51 = vld [vmem:[%s4558_s13 + $0x18] sm:$0xff] (%p3836_p4) }
 0x324   : > { %v2919_v50 = vld [vmem:[%s4558_s13 + $0x10] sm:$0xff] (%p3836_p4)  ;;  %2922 = vst [vmem:[%s2857_s25 + $0x28] sm:$0xff] (%p3836_p4), %v2921_v51 }
 0x325   : > { %2920 = vst [vmem:[%s2857_s25 + $0x20] sm:$0xff] (%p3836_p4), %v2919_v50 }
 0x32b   : > { %v2794_v35 = vpop.permute.xlu1 %2793 }
 0x32c   : > { %2837 = vst.msk [vmem:[%s4558_s13 + $0x28] sm:$0xff] %vm2831_vm5, %v2794_v35  ;;  %v2792_v36 = vpop.permute.xlu0 %2791 }
 0x32d   : > { %2836 = vst.msk [vmem:[%s4558_s13 + $0x20] sm:$0xff] %vm2831_vm5, %v2792_v36 }
 0x333   : > { %v2925_v55 = vld [vmem:[%s4558_s13 + $0x28] sm:$0xff] (%p3836_p4) }
 0x334   : > { %v2923_v59 = vld [vmem:[%s4558_s13 + $0x20] sm:$0xff] (%p3836_p4)  ;;  %2926 = vst [vmem:[%s2857_s25 + $0x48] sm:$0xff] (%p3836_p4), %v2925_v55 }
 0x335   : > { %2924 = vst [vmem:[%s2857_s25 + $0x40] sm:$0xff] (%p3836_p4), %v2923_v59 }
 0x33b   : > { %v2798_v37 = vpop.permute.xlu1 %2797 }
 0x33c   : > { %2839 = vst.msk [vmem:[%s4558_s13 + $0x38] sm:$0xff] %vm2831_vm5, %v2798_v37  ;;  %v2796_v31 = vpop.permute.xlu0 %2795 }
 0x33d   : > { %2838 = vst.msk [vmem:[%s4558_s13 + $0x30] sm:$0xff] %vm2831_vm5, %v2796_v31 }
 0x343   : > { %v2929_v57 = vld [vmem:[%s4558_s13 + $0x38] sm:$0xff] (%p3836_p4) }
 0x344   : > { %v2927_v56 = vld [vmem:[%s4558_s13 + $0x30] sm:$0xff] (%p3836_p4)  ;;  %2930 = vst [vmem:[%s2857_s25 + $0x68] sm:$0xff] (%p3836_p4), %v2929_v57 }
 0x345   : > { %2928 = vst [vmem:[%s2857_s25 + $0x60] sm:$0xff] (%p3836_p4), %v2927_v56 }
 0x34b   : > { %v2802_v38 = vpop.permute.xlu1 %2801 }
 0x34c   : > { %2841 = vst.msk [vmem:[%s4558_s13 + $0x48] sm:$0xff] %vm2831_vm5, %v2802_v38  ;;  %v2800_v41 = vpop.permute.xlu0 %2799 }
 0x34d   : > { %2840 = vst.msk [vmem:[%s4558_s13 + $0x40] sm:$0xff] %vm2831_vm5, %v2800_v41 }
 0x353   : > { %v2933_v2 = vld [vmem:[%s4558_s13 + $0x48] sm:$0xff] (%p3836_p4) }
 0x354   : > { %v2931_v58 = vld [vmem:[%s4558_s13 + $0x40] sm:$0xff] (%p3836_p4)  ;;  %2934 = vst [vmem:[%s2857_s25 + $0x88] sm:$0xff] (%p3836_p4), %v2933_v2 }
 0x355   : > { %2932 = vst [vmem:[%s2857_s25 + $0x80] sm:$0xff] (%p3836_p4), %v2931_v58 }
 0x35c   : > { %v2806_v42 = vpop.permute.xlu1 %2805 }
 0x35d   : > { %2843 = vst.msk [vmem:[%s4558_s13 + $0x58] sm:$0xff] %vm2831_vm5, %v2806_v42  ;;  %v2804_v43 = vpop.permute.xlu0 %2803 }
 0x35e   : > { %2842 = vst.msk [vmem:[%s4558_s13 + $0x50] sm:$0xff] %vm2831_vm5, %v2804_v43 }
 0x364   : > { %v2810_v39 = vpop.permute.xlu1 %2809  ;;  %v2937_v16 = vld [vmem:[%s4558_s13 + $0x58] sm:$0xff] (%p3836_p4) }
 0x365   : > { %2845 = vst.msk [vmem:[%s4558_s13 + $0x68] sm:$0xff] %vm2831_vm5, %v2810_v39  ;;  %v2808_v45 = vpop.permute.xlu0 %2807  ;;  %v2935_v60 = vld [vmem:[%s4558_s13 + $0x50] sm:$0xff] (%p3836_p4)  ;;  %2938 = vst [vmem:[%s2857_s25 + $0xa8] sm:$0xff] (%p3836_p4), %v2937_v16 }
 0x366   : > { %2844 = vst.msk [vmem:[%s4558_s13 + $0x60] sm:$0xff] %vm2831_vm5, %v2808_v45  ;;  %2936 = vst [vmem:[%s2857_s25 + $0xa0] sm:$0xff] (%p3836_p4), %v2935_v60 }
 0x368   : > { %2854 = sbr.rel (!%p3836_p4) target bundleno = 887 (0x377), region = 60 }
 0x36c   : > { %v2814_v46 = vpop.permute.xlu1 %2813  ;;  %v2941_v4 = vld [vmem:[%s4558_s13 + $0x68] sm:$0xff] (%p3836_p4) }
 0x36d   : > { %2847 = vst.msk [vmem:[%s4558_s13 + $0x78] sm:$0xff] %vm2831_vm5, %v2814_v46  ;;  %v2812_v47 = vpop.permute.xlu0 %2811  ;;  %v2939_v3 = vld [vmem:[%s4558_s13 + $0x60] sm:$0xff] (%p3836_p4)  ;;  %2942 = vst [vmem:[%s2857_s25 + $0xc8] sm:$0xff] (%p3836_p4), %v2941_v4 }
 0x36e   : > { %2846 = vst.msk [vmem:[%s4558_s13 + $0x70] sm:$0xff] %vm2831_vm5, %v2812_v47  ;;  %2940 = vst [vmem:[%s2857_s25 + $0xc0] sm:$0xff] (%p3836_p4), %v2939_v3 }
 0x374   : > { %v2945_v5 = vld [vmem:[%s4558_s13 + $0x78] sm:$0xff] }
 0x375   : > { %v2943_v54 = vld [vmem:[%s4558_s13 + $0x70] sm:$0xff]  ;;  %2946 = vst [vmem:[%s2857_s25 + $0xe8] sm:$0xff] %v2945_v5 }
 0x376   : > { %2944 = vst [vmem:[%s2857_s25 + $0xe0] sm:$0xff] %v2943_v54 }
 0x377 PF: > { %p20_p8 = scmp.ge.s32.totalorder %s3826_s8, 4   ;;  %s4812_s13 = smov %s3716_s14 }
 0x378   : > { %s4813_s14 = smov %s3834_s18  ;;  %s4814_s15 = smov %s3826_s8 }
 0x379   :  { %22 = sbr.rel (!%p20_p8) target bundleno = 5 (0x5), region = 124 }

</bundles_post_ra>
